<compile_context>
chip_gen: v6e
topology: v6e:2x2x1
jax: 0.10.0
libtpu: 0.0.40
codegen_flags: <defaults>
</compile_context>

<pallas_src>
import functools

import jax
import jax.numpy as jnp
from jax import lax
from jax.experimental import pallas as pl
from jax.experimental.pallas import tpu as pltpu

EPS = 1e-5


# ----------------------------- Pallas kernel --------------------------------

def _conv3x3_bn_relu(flat, w_ref, s_ref, b_ref, *, ho, wo):
    """3x3 'SAME' conv + folded BN + ReLU on a spatially-flattened activation.

    flat:   (M, C)        M = Ho*Wo rows (sublanes), C channels (lanes)
    w_ref:  (9*C, Cout)   packed (ky, kx, cin) -> cout weights
    s_ref:  (1, Cout)     gamma / sqrt(running_var + eps)
    b_ref:  (1, Cout)     (conv_bias - running_mean) * scale + beta
    returns (M, Cout) float32
    """
    m, c = flat.shape
    # Flat row index i = r*Wo + col.  Row validity of a +/-1 row shift can be
    # tested directly on i; column validity needs col, generated as a
    # sublane-direction iota over (Ho, Wo, C) and flattened.
    flat_idx = lax.broadcasted_iota(jnp.int32, (m, c), 0)
    col = lax.broadcasted_iota(jnp.int32, (ho, wo, c), 1).reshape(m, c)

    taps = []
    for dy in (-1, 0, 1):
        for dx in (-1, 0, 1):
            t = dy * wo + dx  # tap[i] reads flat[i + t] when in-bounds
            shifted = flat if t == 0 else pltpu.roll(flat, (-t) % m, axis=0)
            conds = []
            if dy == -1:
                conds.append(flat_idx >= wo)
            elif dy == 1:
                conds.append(flat_idx < m - wo)
            if dx == -1:
                conds.append(col >= 1)
            elif dx == 1:
                conds.append(col < wo - 1)
            if conds:
                mask = functools.reduce(lambda a, b: a & b, conds)
                shifted = jnp.where(mask, shifted, 0.0)
            taps.append(shifted)

    patches = jnp.concatenate(taps, axis=-1)             # (M, 9*C) lane concat
    y = jnp.dot(patches, w_ref[...], preferred_element_type=jnp.float32)
    y = y * s_ref[...] + b_ref[...]                      # folded BN affine
    return jnp.maximum(y, 0.0)                           # ReLU


def _down_conv_kernel(x_ref, w1_ref, s1_ref, b1_ref, w2_ref, s2_ref, b2_ref,
                      o_ref, *, ho, wo, cin):
    """Fused MaxPool2d(2) -> Conv3x3+BN+ReLU -> Conv3x3+BN+ReLU (one batch)."""
    # x_ref: (1, H, Wo, 2*Cin) -- adjacent column pairs packed on the lane axis.
    x = x_ref[0]                                          # (H, Wo, 2*Cin)
    # 2x2 max pool: horizontal pair-max via lane slices, vertical pair-max via
    # a leading-dim split (no strided HBM views, input read exactly once).
    xh = jnp.maximum(x[:, :, :cin], x[:, :, cin:])        # (H, Wo, Cin)
    x4 = xh.reshape(ho, 2, wo, cin)                       # (Ho, 2, Wo, Cin)
    pooled = jnp.maximum(x4[:, 0], x4[:, 1])              # (Ho, Wo, Cin)
    flat = pooled.reshape(ho * wo, cin)                   # (M, Cin)

    y1 = _conv3x3_bn_relu(flat, w1_ref, s1_ref, b1_ref, ho=ho, wo=wo)
    y2 = _conv3x3_bn_relu(y1, w2_ref, s2_ref, b2_ref, ho=ho, wo=wo)
    o_ref[0] = y2                                         # (M, Cout)


# -------------------------------- wrapper ------------------------------------

def down_conv_forward(x_nchw, kparams):
    """DownConv.forward: MaxPool2d(2) -> (Conv3x3+BN+ReLU) x 2, NCHW in/out."""
    n, cin, h, w = x_nchw.shape
    assert h % 2 == 0 and w % 2 == 0, "MaxPool2d(2) path assumes even H, W"
    ho, wo = h // 2, w // 2
    m = ho * wo
    w1, s1, b1 = kparams["layer1"]
    w2, s2, b2 = kparams["layer2"]
    cout = w1.shape[-1]

    # NCHW -> NHWC, then pack adjacent column pairs onto the lane axis.  This
    # is one layout pass in XLA (no 9x im2col, no strided-view copies).
    x = jnp.transpose(x_nchw, (0, 2, 3, 1)).reshape(n, h, wo, 2 * cin)

    kernel = functools.partial(_down_conv_kernel, ho=ho, wo=wo, cin=cin)
    itemsize = 4
    cost = pl.CostEstimate(
        flops=2 * n * m * 9 * (cin * cout + cout * cout),
        transcendentals=0,
        bytes_accessed=itemsize * (x.size + w1.size + w2.size
                                   + 2 * (s1.size + b1.size) + n * m * cout),
    )

    out = pl.pallas_call(
        kernel,
        out_shape=jax.ShapeDtypeStruct((n, m, cout), jnp.float32),
        grid=(n,),
        in_specs=[
            pl.BlockSpec((1, h, wo, 2 * cin), lambda i: (i, 0, 0, 0)),
            pl.BlockSpec((9 * cin, cout), lambda i: (0, 0)),
            pl.BlockSpec((1, cout), lambda i: (0, 0)),
            pl.BlockSpec((1, cout), lambda i: (0, 0)),
            pl.BlockSpec((9 * cout, cout), lambda i: (0, 0)),
            pl.BlockSpec((1, cout), lambda i: (0, 0)),
            pl.BlockSpec((1, cout), lambda i: (0, 0)),
        ],
        out_specs=pl.BlockSpec((1, m, cout), lambda i: (i, 0, 0)),
        compiler_params=pltpu.CompilerParams(
            dimension_semantics=("parallel",),
            vmem_limit_bytes=32 * 1024 * 1024,
        ),
        cost_estimate=cost,
    )(x, w1, s1.reshape(1, cout), b1.reshape(1, cout),
      w2, s2.reshape(1, cout), b2.reshape(1, cout))

    # (N, Ho*Wo, Cout) -> (N, Cout, Ho, Wo)
    return jnp.transpose(out.reshape(n, ho, wo, cout), (0, 3, 1, 2))


def fold_conv_bn(w_oihw, conv_b, gamma, beta, mean, var):
    """Fold eval-mode BatchNorm into a per-output-channel affine and pack the
    conv weights as a single (9*Cin, Cout) matrix (row order = ky, kx, cin)."""
    scale = gamma / jnp.sqrt(var + EPS)
    bias = (conv_b - mean) * scale + beta
    cout, cin = w_oihw.shape[0], w_oihw.shape[1]
    w_packed = jnp.transpose(w_oihw, (2, 3, 1, 0)).reshape(9 * cin, cout)
    return w_packed, scale, bias


# --------------------- deterministic parameter init -------------------------

def make_raw_params(key, in_c, out_c):
    ks = jax.random.split(key, 6)

    def conv_w(k, co, ci):
        bound = 1.0 / jnp.sqrt(ci * 9.0)
        return jax.random.uniform(k, (co, ci, 3, 3), jnp.float32, -bound, bound)

    def conv_b(k, co, ci):
        bound = 1.0 / jnp.sqrt(ci * 9.0)
        return jax.random.uniform(k, (co,), jnp.float32, -bound, bound)

    def bn(k, co):
        k1, k2, k3, k4 = jax.random.split(k, 4)
        gamma = 1.0 + 0.1 * jax.random.normal(k1, (co,), jnp.float32)
        beta = 0.1 * jax.random.normal(k2, (co,), jnp.float32)
        mean = 0.1 * jax.random.normal(k3, (co,), jnp.float32)
        var = 1.0 + 0.1 * jnp.abs(jax.random.normal(k4, (co,), jnp.float32))
        return gamma, beta, mean, var

    return {
        "w1": conv_w(ks[0], out_c, in_c), "b1": conv_b(ks[1], out_c, in_c),
        "bn1": bn(ks[2], out_c),
        "w2": conv_w(ks[3], out_c, out_c), "b2": conv_b(ks[4], out_c, out_c),
        "bn2": bn(ks[5], out_c),
    }


# ------------------------- plain-JAX reference -------------------------------

def reference_forward(x_nchw, p):
    x = lax.reduce_window(x_nchw, -jnp.inf, lax.max,
                          (1, 1, 2, 2), (1, 1, 2, 2), "VALID")

    def conv_bn_relu(x, w, b, bn):
        gamma, beta, mean, var = bn
        y = lax.conv_general_dilated(
            x, w, window_strides=(1, 1), padding="SAME",
            dimension_numbers=("NCHW", "OIHW", "NCHW"))
        y = y + b[None, :, None, None]
        y = (y - mean[None, :, None, None]) / jnp.sqrt(var + EPS)[None, :, None, None]
        y = y * gamma[None, :, None, None] + beta[None, :, None, None]
        return jnp.maximum(y, 0.0)

    x = conv_bn_relu(x, p["w1"], p["b1"], p["bn1"])
    x = conv_bn_relu(x, p["w2"], p["b2"], p["bn2"])
    return x


if __name__ == "__main__":
    N, IN_C, OUT_C, H, W = 2, 4, 8, 16, 16
    kx, kp = jax.random.split(jax.random.PRNGKey(0))
    x = jax.random.normal(kx, (N, IN_C, H, W), dtype=jnp.float32)

    raw = make_raw_params(kp, IN_C, OUT_C)
    kparams = {
        "layer1": fold_conv_bn(raw["w1"], raw["b1"], *raw["bn1"]),
        "layer2": fold_conv_bn(raw["w2"], raw["b2"], *raw["bn2"]),
    }

    out = jax.jit(down_conv_forward)(x, kparams)
    out = jax.block_until_ready(out)
    assert out.shape == (N, OUT_C, H // 2, W // 2), out.shape

    ref = reference_forward(x, raw)
    err = float(jnp.max(jnp.abs(out - ref)))
    assert jnp.allclose(out, ref, atol=1e-3, rtol=1e-3), err

    print("KERNEL_OK")
</pallas_src>

<mosaic_0001>
module attributes {stable_mosaic.version = 11 : i64} {
  func.func @_down_conv_kernel(%arg0: i32, %arg1: memref<1x16x8x8xf32, #tpu.memory_space<vmem>>, %arg2: memref<36x8xf32, #tpu.memory_space<vmem>>, %arg3: memref<1x8xf32, #tpu.memory_space<vmem>>, %arg4: memref<1x8xf32, #tpu.memory_space<vmem>>, %arg5: memref<72x8xf32, #tpu.memory_space<vmem>>, %arg6: memref<1x8xf32, #tpu.memory_space<vmem>>, %arg7: memref<1x8xf32, #tpu.memory_space<vmem>>, %arg8: memref<1x64x8xf32, #tpu.memory_space<vmem>>) attributes {dimension_semantics = [#tpu.dimension_semantics<parallel>], iteration_bounds = array<i64: 2>, scalar_prefetch = 0 : i64, scratch_operands = 0 : i64, tpu.core_type = #tpu.core_type<tc>, window_params = [{transform_indices = @transform_0, window_bounds = array<i64: 1, 16, 8, 8>}, {pipeline_mode = #tpu.pipeline_mode<synchronous>, transform_indices = @transform_1, window_bounds = array<i64: 36, 8>}, {pipeline_mode = #tpu.pipeline_mode<synchronous>, transform_indices = @transform_2, window_bounds = array<i64: 1, 8>}, {pipeline_mode = #tpu.pipeline_mode<synchronous>, transform_indices = @transform_3, window_bounds = array<i64: 1, 8>}, {pipeline_mode = #tpu.pipeline_mode<synchronous>, transform_indices = @transform_4, window_bounds = array<i64: 72, 8>}, {pipeline_mode = #tpu.pipeline_mode<synchronous>, transform_indices = @transform_5, window_bounds = array<i64: 1, 8>}, {pipeline_mode = #tpu.pipeline_mode<synchronous>, transform_indices = @transform_6, window_bounds = array<i64: 1, 8>}, {transform_indices = @transform_7, window_bounds = array<i64: 1, 64, 8>}]} {
    %c0 = arith.constant 0 : index
    %c0_0 = arith.constant 0 : index
    %c0_1 = arith.constant 0 : index
    %c0_2 = arith.constant 0 : index
    %0 = vector.load %arg1[%c0, %c0_0, %c0_1, %c0_2] : memref<1x16x8x8xf32, #tpu.memory_space<vmem>>, vector<1x16x8x8xf32>
    %1 = vector.shape_cast %0 : vector<1x16x8x8xf32> to vector<16x8x8xf32>
    %2 = vector.extract_strided_slice %1 {offsets = [0, 0, 0], sizes = [16, 8, 4], strides = [1, 1, 1]} : vector<16x8x8xf32> to vector<16x8x4xf32>
    %3 = vector.extract_strided_slice %1 {offsets = [0, 0, 4], sizes = [16, 8, 4], strides = [1, 1, 1]} : vector<16x8x8xf32> to vector<16x8x4xf32>
    %4 = arith.maximumf %2, %3 : vector<16x8x4xf32>
    %5 = vector.shape_cast %4 : vector<16x8x4xf32> to vector<8x2x8x4xf32>
    %6 = vector.extract_strided_slice %5 {offsets = [0, 0, 0, 0], sizes = [8, 1, 8, 4], strides = [1, 1, 1, 1]} : vector<8x2x8x4xf32> to vector<8x1x8x4xf32>
    %7 = vector.shape_cast %6 : vector<8x1x8x4xf32> to vector<8x8x4xf32>
    %8 = vector.extract_strided_slice %5 {offsets = [0, 1, 0, 0], sizes = [8, 1, 8, 4], strides = [1, 1, 1, 1]} : vector<8x2x8x4xf32> to vector<8x1x8x4xf32>
    %9 = vector.shape_cast %8 : vector<8x1x8x4xf32> to vector<8x8x4xf32>
    %10 = arith.maximumf %7, %9 : vector<8x8x4xf32>
    %11 = vector.shape_cast %10 : vector<8x8x4xf32> to vector<64x4xf32>
    %12 = tpu.iota {dimensions = array<i32: 0>} : vector<64x4xi32>
    %13 = tpu.iota {dimensions = array<i32: 1>} : vector<8x8x4xi32>
    %14 = vector.shape_cast %13 : vector<8x8x4xi32> to vector<64x4xi32>
    %c9_i32 = arith.constant 9 : i32
    %15 = tpu.dynamic_rotate %11 by %c9_i32 dim 0 : vector<64x4xf32>, i32 -> vector<64x4xf32>
    %c8_i32 = arith.constant 8 : i32
    %16 = vector.broadcast %c8_i32 : i32 to vector<64x4xi32>
    %17 = arith.cmpi sge, %12, %16 : vector<64x4xi32>
    %c1_i32 = arith.constant 1 : i32
    %18 = vector.broadcast %c1_i32 : i32 to vector<64x4xi32>
    %19 = arith.cmpi sge, %14, %18 : vector<64x4xi32>
    %20 = arith.andi %17, %19 : vector<64x4xi1>
    %cst = arith.constant 0.000000e+00 : f32
    %21 = vector.broadcast %cst : f32 to vector<64x4xf32>
    %22 = arith.select %20, %15, %21 : vector<64x4xi1>, vector<64x4xf32>
    %c8_i32_3 = arith.constant 8 : i32
    %23 = tpu.dynamic_rotate %11 by %c8_i32_3 dim 0 : vector<64x4xf32>, i32 -> vector<64x4xf32>
    %c8_i32_4 = arith.constant 8 : i32
    %24 = vector.broadcast %c8_i32_4 : i32 to vector<64x4xi32>
    %25 = arith.cmpi sge, %12, %24 : vector<64x4xi32>
    %cst_5 = arith.constant 0.000000e+00 : f32
    %26 = vector.broadcast %cst_5 : f32 to vector<64x4xf32>
    %27 = arith.select %25, %23, %26 : vector<64x4xi1>, vector<64x4xf32>
    %c7_i32 = arith.constant 7 : i32
    %28 = tpu.dynamic_rotate %11 by %c7_i32 dim 0 : vector<64x4xf32>, i32 -> vector<64x4xf32>
    %c8_i32_6 = arith.constant 8 : i32
    %29 = vector.broadcast %c8_i32_6 : i32 to vector<64x4xi32>
    %30 = arith.cmpi sge, %12, %29 : vector<64x4xi32>
    %c7_i32_7 = arith.constant 7 : i32
    %31 = vector.broadcast %c7_i32_7 : i32 to vector<64x4xi32>
    %32 = arith.cmpi slt, %14, %31 : vector<64x4xi32>
    %33 = arith.andi %30, %32 : vector<64x4xi1>
    %cst_8 = arith.constant 0.000000e+00 : f32
    %34 = vector.broadcast %cst_8 : f32 to vector<64x4xf32>
    %35 = arith.select %33, %28, %34 : vector<64x4xi1>, vector<64x4xf32>
    %c1_i32_9 = arith.constant 1 : i32
    %36 = tpu.dynamic_rotate %11 by %c1_i32_9 dim 0 : vector<64x4xf32>, i32 -> vector<64x4xf32>
    %c1_i32_10 = arith.constant 1 : i32
    %37 = vector.broadcast %c1_i32_10 : i32 to vector<64x4xi32>
    %38 = arith.cmpi sge, %14, %37 : vector<64x4xi32>
    %cst_11 = arith.constant 0.000000e+00 : f32
    %39 = vector.broadcast %cst_11 : f32 to vector<64x4xf32>
    %40 = arith.select %38, %36, %39 : vector<64x4xi1>, vector<64x4xf32>
    %c63_i32 = arith.constant 63 : i32
    %41 = tpu.dynamic_rotate %11 by %c63_i32 dim 0 : vector<64x4xf32>, i32 -> vector<64x4xf32>
    %c7_i32_12 = arith.constant 7 : i32
    %42 = vector.broadcast %c7_i32_12 : i32 to vector<64x4xi32>
    %43 = arith.cmpi slt, %14, %42 : vector<64x4xi32>
    %cst_13 = arith.constant 0.000000e+00 : f32
    %44 = vector.broadcast %cst_13 : f32 to vector<64x4xf32>
    %45 = arith.select %43, %41, %44 : vector<64x4xi1>, vector<64x4xf32>
    %c57_i32 = arith.constant 57 : i32
    %46 = tpu.dynamic_rotate %11 by %c57_i32 dim 0 : vector<64x4xf32>, i32 -> vector<64x4xf32>
    %c56_i32 = arith.constant 56 : i32
    %47 = vector.broadcast %c56_i32 : i32 to vector<64x4xi32>
    %48 = arith.cmpi slt, %12, %47 : vector<64x4xi32>
    %c1_i32_14 = arith.constant 1 : i32
    %49 = vector.broadcast %c1_i32_14 : i32 to vector<64x4xi32>
    %50 = arith.cmpi sge, %14, %49 : vector<64x4xi32>
    %51 = arith.andi %48, %50 : vector<64x4xi1>
    %cst_15 = arith.constant 0.000000e+00 : f32
    %52 = vector.broadcast %cst_15 : f32 to vector<64x4xf32>
    %53 = arith.select %51, %46, %52 : vector<64x4xi1>, vector<64x4xf32>
    %c56_i32_16 = arith.constant 56 : i32
    %54 = tpu.dynamic_rotate %11 by %c56_i32_16 dim 0 : vector<64x4xf32>, i32 -> vector<64x4xf32>
    %c56_i32_17 = arith.constant 56 : i32
    %55 = vector.broadcast %c56_i32_17 : i32 to vector<64x4xi32>
    %56 = arith.cmpi slt, %12, %55 : vector<64x4xi32>
    %cst_18 = arith.constant 0.000000e+00 : f32
    %57 = vector.broadcast %cst_18 : f32 to vector<64x4xf32>
    %58 = arith.select %56, %54, %57 : vector<64x4xi1>, vector<64x4xf32>
    %c55_i32 = arith.constant 55 : i32
    %59 = tpu.dynamic_rotate %11 by %c55_i32 dim 0 : vector<64x4xf32>, i32 -> vector<64x4xf32>
    %c56_i32_19 = arith.constant 56 : i32
    %60 = vector.broadcast %c56_i32_19 : i32 to vector<64x4xi32>
    %61 = arith.cmpi slt, %12, %60 : vector<64x4xi32>
    %c7_i32_20 = arith.constant 7 : i32
    %62 = vector.broadcast %c7_i32_20 : i32 to vector<64x4xi32>
    %63 = arith.cmpi slt, %14, %62 : vector<64x4xi32>
    %64 = arith.andi %61, %63 : vector<64x4xi1>
    %cst_21 = arith.constant 0.000000e+00 : f32
    %65 = vector.broadcast %cst_21 : f32 to vector<64x4xf32>
    %66 = arith.select %64, %59, %65 : vector<64x4xi1>, vector<64x4xf32>
    %67 = tpu.concatenate %22, %27, %35, %40, %11, %45, %53, %58, %66 in 1 : vector<64x4xf32>, vector<64x4xf32>, vector<64x4xf32>, vector<64x4xf32>, vector<64x4xf32>, vector<64x4xf32>, vector<64x4xf32>, vector<64x4xf32>, vector<64x4xf32> -> vector<64x36xf32>
    %c0_22 = arith.constant 0 : index
    %c0_23 = arith.constant 0 : index
    %68 = vector.load %arg2[%c0_22, %c0_23] : memref<36x8xf32, #tpu.memory_space<vmem>>, vector<36x8xf32>
    %cst_24 = arith.constant dense<0.000000e+00> : vector<64x8xf32>
    %69 = tpu.matmul %67, %68, %cst_24 {dimension_numbers = #tpu.dot_dimension_numbers<[1], [0], [0], [1], [0, 0, 1, 1], [], []>} : vector<64x36xf32>, vector<36x8xf32>, vector<64x8xf32> -> vector<64x8xf32>
    %c0_25 = arith.constant 0 : index
    %c0_26 = arith.constant 0 : index
    %70 = vector.load %arg3[%c0_25, %c0_26] : memref<1x8xf32, #tpu.memory_space<vmem>>, vector<1x8xf32>
    %71 = vector.broadcast %70 : vector<1x8xf32> to vector<64x8xf32>
    %72 = arith.mulf %69, %71 : vector<64x8xf32>
    %c0_27 = arith.constant 0 : index
    %c0_28 = arith.constant 0 : index
    %73 = vector.load %arg4[%c0_27, %c0_28] : memref<1x8xf32, #tpu.memory_space<vmem>>, vector<1x8xf32>
    %74 = vector.broadcast %73 : vector<1x8xf32> to vector<64x8xf32>
    %75 = arith.addf %72, %74 : vector<64x8xf32>
    %cst_29 = arith.constant 0.000000e+00 : f32
    %76 = vector.broadcast %cst_29 : f32 to vector<64x8xf32>
    %77 = arith.maximumf %75, %76 : vector<64x8xf32>
    %78 = tpu.iota {dimensions = array<i32: 0>} : vector<64x8xi32>
    %79 = tpu.iota {dimensions = array<i32: 1>} : vector<8x8x8xi32>
    %80 = vector.shape_cast %79 : vector<8x8x8xi32> to vector<64x8xi32>
    %c9_i32_30 = arith.constant 9 : i32
    %81 = tpu.dynamic_rotate %77 by %c9_i32_30 dim 0 : vector<64x8xf32>, i32 -> vector<64x8xf32>
    %c8_i32_31 = arith.constant 8 : i32
    %82 = vector.broadcast %c8_i32_31 : i32 to vector<64x8xi32>
    %83 = arith.cmpi sge, %78, %82 : vector<64x8xi32>
    %c1_i32_32 = arith.constant 1 : i32
    %84 = vector.broadcast %c1_i32_32 : i32 to vector<64x8xi32>
    %85 = arith.cmpi sge, %80, %84 : vector<64x8xi32>
    %86 = arith.andi %83, %85 : vector<64x8xi1>
    %cst_33 = arith.constant 0.000000e+00 : f32
    %87 = vector.broadcast %cst_33 : f32 to vector<64x8xf32>
    %88 = arith.select %86, %81, %87 : vector<64x8xi1>, vector<64x8xf32>
    %c8_i32_34 = arith.constant 8 : i32
    %89 = tpu.dynamic_rotate %77 by %c8_i32_34 dim 0 : vector<64x8xf32>, i32 -> vector<64x8xf32>
    %c8_i32_35 = arith.constant 8 : i32
    %90 = vector.broadcast %c8_i32_35 : i32 to vector<64x8xi32>
    %91 = arith.cmpi sge, %78, %90 : vector<64x8xi32>
    %cst_36 = arith.constant 0.000000e+00 : f32
    %92 = vector.broadcast %cst_36 : f32 to vector<64x8xf32>
    %93 = arith.select %91, %89, %92 : vector<64x8xi1>, vector<64x8xf32>
    %c7_i32_37 = arith.constant 7 : i32
    %94 = tpu.dynamic_rotate %77 by %c7_i32_37 dim 0 : vector<64x8xf32>, i32 -> vector<64x8xf32>
    %c8_i32_38 = arith.constant 8 : i32
    %95 = vector.broadcast %c8_i32_38 : i32 to vector<64x8xi32>
    %96 = arith.cmpi sge, %78, %95 : vector<64x8xi32>
    %c7_i32_39 = arith.constant 7 : i32
    %97 = vector.broadcast %c7_i32_39 : i32 to vector<64x8xi32>
    %98 = arith.cmpi slt, %80, %97 : vector<64x8xi32>
    %99 = arith.andi %96, %98 : vector<64x8xi1>
    %cst_40 = arith.constant 0.000000e+00 : f32
    %100 = vector.broadcast %cst_40 : f32 to vector<64x8xf32>
    %101 = arith.select %99, %94, %100 : vector<64x8xi1>, vector<64x8xf32>
    %c1_i32_41 = arith.constant 1 : i32
    %102 = tpu.dynamic_rotate %77 by %c1_i32_41 dim 0 : vector<64x8xf32>, i32 -> vector<64x8xf32>
    %c1_i32_42 = arith.constant 1 : i32
    %103 = vector.broadcast %c1_i32_42 : i32 to vector<64x8xi32>
    %104 = arith.cmpi sge, %80, %103 : vector<64x8xi32>
    %cst_43 = arith.constant 0.000000e+00 : f32
    %105 = vector.broadcast %cst_43 : f32 to vector<64x8xf32>
    %106 = arith.select %104, %102, %105 : vector<64x8xi1>, vector<64x8xf32>
    %c63_i32_44 = arith.constant 63 : i32
    %107 = tpu.dynamic_rotate %77 by %c63_i32_44 dim 0 : vector<64x8xf32>, i32 -> vector<64x8xf32>
    %c7_i32_45 = arith.constant 7 : i32
    %108 = vector.broadcast %c7_i32_45 : i32 to vector<64x8xi32>
    %109 = arith.cmpi slt, %80, %108 : vector<64x8xi32>
    %cst_46 = arith.constant 0.000000e+00 : f32
    %110 = vector.broadcast %cst_46 : f32 to vector<64x8xf32>
    %111 = arith.select %109, %107, %110 : vector<64x8xi1>, vector<64x8xf32>
    %c57_i32_47 = arith.constant 57 : i32
    %112 = tpu.dynamic_rotate %77 by %c57_i32_47 dim 0 : vector<64x8xf32>, i32 -> vector<64x8xf32>
    %c56_i32_48 = arith.constant 56 : i32
    %113 = vector.broadcast %c56_i32_48 : i32 to vector<64x8xi32>
    %114 = arith.cmpi slt, %78, %113 : vector<64x8xi32>
    %c1_i32_49 = arith.constant 1 : i32
    %115 = vector.broadcast %c1_i32_49 : i32 to vector<64x8xi32>
    %116 = arith.cmpi sge, %80, %115 : vector<64x8xi32>
    %117 = arith.andi %114, %116 : vector<64x8xi1>
    %cst_50 = arith.constant 0.000000e+00 : f32
    %118 = vector.broadcast %cst_50 : f32 to vector<64x8xf32>
    %119 = arith.select %117, %112, %118 : vector<64x8xi1>, vector<64x8xf32>
    %c56_i32_51 = arith.constant 56 : i32
    %120 = tpu.dynamic_rotate %77 by %c56_i32_51 dim 0 : vector<64x8xf32>, i32 -> vector<64x8xf32>
    %c56_i32_52 = arith.constant 56 : i32
    %121 = vector.broadcast %c56_i32_52 : i32 to vector<64x8xi32>
    %122 = arith.cmpi slt, %78, %121 : vector<64x8xi32>
    %cst_53 = arith.constant 0.000000e+00 : f32
    %123 = vector.broadcast %cst_53 : f32 to vector<64x8xf32>
    %124 = arith.select %122, %120, %123 : vector<64x8xi1>, vector<64x8xf32>
    %c55_i32_54 = arith.constant 55 : i32
    %125 = tpu.dynamic_rotate %77 by %c55_i32_54 dim 0 : vector<64x8xf32>, i32 -> vector<64x8xf32>
    %c56_i32_55 = arith.constant 56 : i32
    %126 = vector.broadcast %c56_i32_55 : i32 to vector<64x8xi32>
    %127 = arith.cmpi slt, %78, %126 : vector<64x8xi32>
    %c7_i32_56 = arith.constant 7 : i32
    %128 = vector.broadcast %c7_i32_56 : i32 to vector<64x8xi32>
    %129 = arith.cmpi slt, %80, %128 : vector<64x8xi32>
    %130 = arith.andi %127, %129 : vector<64x8xi1>
    %cst_57 = arith.constant 0.000000e+00 : f32
    %131 = vector.broadcast %cst_57 : f32 to vector<64x8xf32>
    %132 = arith.select %130, %125, %131 : vector<64x8xi1>, vector<64x8xf32>
    %133 = tpu.concatenate %88, %93, %101, %106, %77, %111, %119, %124, %132 in 1 : vector<64x8xf32>, vector<64x8xf32>, vector<64x8xf32>, vector<64x8xf32>, vector<64x8xf32>, vector<64x8xf32>, vector<64x8xf32>, vector<64x8xf32>, vector<64x8xf32> -> vector<64x72xf32>
    %c0_58 = arith.constant 0 : index
    %c0_59 = arith.constant 0 : index
    %134 = vector.load %arg5[%c0_58, %c0_59] : memref<72x8xf32, #tpu.memory_space<vmem>>, vector<72x8xf32>
    %cst_60 = arith.constant dense<0.000000e+00> : vector<64x8xf32>
    %135 = tpu.matmul %133, %134, %cst_60 {dimension_numbers = #tpu.dot_dimension_numbers<[1], [0], [0], [1], [0, 0, 1, 1], [], []>} : vector<64x72xf32>, vector<72x8xf32>, vector<64x8xf32> -> vector<64x8xf32>
    %c0_61 = arith.constant 0 : index
    %c0_62 = arith.constant 0 : index
    %136 = vector.load %arg6[%c0_61, %c0_62] : memref<1x8xf32, #tpu.memory_space<vmem>>, vector<1x8xf32>
    %137 = vector.broadcast %136 : vector<1x8xf32> to vector<64x8xf32>
    %138 = arith.mulf %135, %137 : vector<64x8xf32>
    %c0_63 = arith.constant 0 : index
    %c0_64 = arith.constant 0 : index
    %139 = vector.load %arg7[%c0_63, %c0_64] : memref<1x8xf32, #tpu.memory_space<vmem>>, vector<1x8xf32>
    %140 = vector.broadcast %139 : vector<1x8xf32> to vector<64x8xf32>
    %141 = arith.addf %138, %140 : vector<64x8xf32>
    %cst_65 = arith.constant 0.000000e+00 : f32
    %142 = vector.broadcast %cst_65 : f32 to vector<64x8xf32>
    %143 = arith.maximumf %141, %142 : vector<64x8xf32>
    %c0_66 = arith.constant 0 : index
    %c0_67 = arith.constant 0 : index
    %c0_68 = arith.constant 0 : index
    %144 = vector.load %arg8[%c0_66, %c0_67, %c0_68] : memref<1x64x8xf32, #tpu.memory_space<vmem>>, vector<1x64x8xf32>
    %145 = vector.shape_cast %144 : vector<1x64x8xf32> to vector<64x8xf32>
    %146 = vector.shape_cast %143 : vector<64x8xf32> to vector<1x64x8xf32>
    tpu.vector_store %arg8[%c0_66, %c0_67, %c0_68], %146 {strides = array<i32>} : memref<1x64x8xf32, #tpu.memory_space<vmem>>, vector<1x64x8xf32>,
    return
  }
  func.func @transform_0(%arg0: i32) -> (i32, i32, i32, i32) {
    %c0_i32 = arith.constant 0 : i32
    %c0_i32_0 = arith.constant 0 : i32
    %c0_i32_1 = arith.constant 0 : i32
    %c0_i32_2 = arith.constant 0 : i32
    return %arg0, %c0_i32, %c0_i32_0, %c0_i32_1 : i32, i32, i32, i32
  }
  func.func @transform_1(%arg0: i32) -> (i32, i32) {
    %c0_i32 = arith.constant 0 : i32
    %c0_i32_0 = arith.constant 0 : i32
    %c0_i32_1 = arith.constant 0 : i32
    return %c0_i32, %c0_i32_0 : i32, i32
  }
  func.func @transform_2(%arg0: i32) -> (i32, i32) {
    %c0_i32 = arith.constant 0 : i32
    %c0_i32_0 = arith.constant 0 : i32
    %c0_i32_1 = arith.constant 0 : i32
    return %c0_i32, %c0_i32_0 : i32, i32
  }
  func.func @transform_3(%arg0: i32) -> (i32, i32) {
    %c0_i32 = arith.constant 0 : i32
    %c0_i32_0 = arith.constant 0 : i32
    %c0_i32_1 = arith.constant 0 : i32
    return %c0_i32, %c0_i32_0 : i32, i32
  }
  func.func @transform_4(%arg0: i32) -> (i32, i32) {
    %c0_i32 = arith.constant 0 : i32
    %c0_i32_0 = arith.constant 0 : i32
    %c0_i32_1 = arith.constant 0 : i32
    return %c0_i32, %c0_i32_0 : i32, i32
  }
  func.func @transform_5(%arg0: i32) -> (i32, i32) {
    %c0_i32 = arith.constant 0 : i32
    %c0_i32_0 = arith.constant 0 : i32
    %c0_i32_1 = arith.constant 0 : i32
    return %c0_i32, %c0_i32_0 : i32, i32
  }
  func.func @transform_6(%arg0: i32) -> (i32, i32) {
    %c0_i32 = arith.constant 0 : i32
    %c0_i32_0 = arith.constant 0 : i32
    %c0_i32_1 = arith.constant 0 : i32
    return %c0_i32, %c0_i32_0 : i32, i32
  }
  func.func @transform_7(%arg0: i32) -> (i32, i32, i32) {
    %c0_i32 = arith.constant 0 : i32
    %c0_i32_0 = arith.constant 0 : i32
    %c0_i32_1 = arith.constant 0 : i32
    return %arg0, %c0_i32, %c0_i32_0 : i32, i32, i32
  }
}

</mosaic_0001>

<bundles_post_ra>
// kernel: down_conv_forward.1
= control target key start
LH: loop header
LB: loop body
LE: loop exit
PB: predicated region body
PF: predicated region fallthrough
CT: control target
= control target key end

     0   :  { %s1904_s24 = smov 0   ;;  %s2723_s0 = inlined_call_operand.vmem [shape: f32[2,16,8,8], index: 0, kind: input, shape index: {}]   ;;  %s2724_s1 = inlined_call_operand.vmem [shape: f32[36,8], index: 1, kind: input, shape index: {}]   ;;  %s2725_s2 = inlined_call_operand.vmem [shape: f32[1,8], index: 2, kind: input, shape index: {}]   ;;  %s2726_s3 = inlined_call_operand.vmem [shape: f32[1,8], index: 3, kind: input, shape index: {}]   ;;  %s2727_s4 = inlined_call_operand.vmem [shape: f32[72,8], index: 4, kind: input, shape index: {}]   ;;  %s2728_s5 = inlined_call_operand.vmem [shape: f32[1,8], index: 5, kind: input, shape index: {}]   ;;  %s2729_s6 = inlined_call_operand.vmem [shape: f32[1,8], index: 6, kind: input, shape index: {}]   ;;  %s2730_s7 = inlined_call_operand.vmem [shape: f32[2,64,8], index: 7, kind: output, shape index: {}]  }
   0x1 LB: > { %s1704_s25 = sadd.s32 4294967295, %s1848_s24   ;;  %p1708_p0 = scmp.ge.s32.totalorder %s1848_s24, 1  ;;  %s1848_s24 = sphi %s1904_s24, %s17_s24  }
   0x2   : > { %p237_p1 = scmp.lt.s32.totalorder %s1848_s24, 3 }
   0x4   : > { %p238_p2 = pnand %p1708_p0, %p237_p1 }
   0x5   : > { %p269_p3 = scmp.lt.s32.totalorder (!%p238_p2), %s1704_s25, 1  ;;  %s1850_s30 = smov (!%p238_p2), 124  }
   0x6   : > { %241 = sbr.rel (%p238_p2) target bundleno = 973 (0x3cd), region = 48  ;;  %s1852_s8 = smov (!%p238_p2), 4  }
   0x7   : > { %s1853_s9 = smov (!%p238_p2), 8   ;;  %s1854_s10 = smov (!%p238_p2), 16  }
   0x8   : > { %s1855_s11 = smov (!%p238_p2), 28   ;;  %s1856_s12 = smov (!%p238_p2), 12  }
   0x9   : > { %s1857_s15 = smov (!%p238_p2), 20   ;;  %s1858_s20 = smov (!%p238_p2), 24  }
   0xa   : > { %s1859_s27 = smov (!%p238_p2), 32   ;;  %s1860_s28 = smov (!%p238_p2), 48  }
   0xb   : > { %s2732_s25 = smov (!%p269_p3, %s1704_s25), 1  ;;  %v1851_v16 = vmov 0.0   ;;  %v383_v48 = vlaneseq  ;;  %vm897_vm3 = vcmask 1043456   ;;  %vm795_vm4 = vcmask 31744   ;;  %s1862_s13 = smov 40  }
   0xc   : > { %s1736_s26 = sshll.u32 %s2732_s25, 7  ;;  %vm804_vm5 = vcmask 64512   ;;  %vm813_vm6 = vcmask 97280   ;;  %vm822_vm7 = vcmask 130048   ;;  %vm831_vm8 = vcmask 162816   ;;  %s1863_s14 = smov 64  }
   0xd   : > { %s1918_s29 = scalar_lea.vmem %s2723_s0, %s1736_s26  ;;  %v2002_v54 = vshrl.u32 %v383_v48, 7  ;;  %vm840_vm9 = vcmask 195584   ;;  %vm858_vm10 = vcmask 261120   ;;  %vm849_vm11 = vcmask 228352  }
   0xe   : > { %v281_v0 = vld [vmem:[%s1918_s29 + $0x10] sm:$0xff]  ;;  %v279_v1 = vld [vmem:[%s1918_s29] sm:$0xff]  ;;  %v282_v2 = vld [vmem:[%s1918_s29 + $0x18] sm:$0xff]  ;;  %vm872_vm12 = vcmask 293888   ;;  %vm1428_vm13 = vcmask 326656   ;;  %vm1437_vm14 = vcmask 392192  }
   0xf   : > { %315 = vrot.lane.b32.xlu1 %v281_v0, %s1850_s30  ;;  %311 = vrot.lane.b32.xlu0 %v279_v1, %s1850_s30  ;;  %v280_v3 = vld [vmem:[%s1918_s29 + $0x8] sm:$0xff]  ;;  %v1925_v4 = vld [vmem:[%s1918_s29 + $0x78] sm:$0xff]  ;;  %vm450_vm0 = vcmp.lt.s32.totalorder %v2002_v54, 7  ;;  %vm400_vm1 = vcmp.lt.s32.totalorder %v2002_v54, 1  ;;  %vm417_vm2 = vcmp.ge.s32.totalorder %v2002_v54, 1  ;;  %vm1446_vm15 = vcmask 457728  }
  0x10   : > { %v1928_v5 = vld [vmem:[%s1918_s29 + $0x70] sm:$0xff]  ;;  %v284_v6 = vld [vmem:[%s1918_s29 + $0x28] sm:$0xff]  ;;  %v283_v7 = vld [vmem:[%s1918_s29 + $0x20] sm:$0xff] }
  0x11   : > { %v286_v8 = vld [vmem:[%s1918_s29 + $0x38] sm:$0xff]  ;;  %v285_v9 = vld [vmem:[%s1918_s29 + $0x30] sm:$0xff]  ;;  %v288_v10 = vld [vmem:[%s1918_s29 + $0x48] sm:$0xff] }
  0x12   : > { %v287_v11 = vld [vmem:[%s1918_s29 + $0x40] sm:$0xff]  ;;  %v1939_v12 = vld [vmem:[%s1918_s29 + $0x58] sm:$0xff]  ;;  %v1942_v13 = vld [vmem:[%s1918_s29 + $0x50] sm:$0xff] }
  0x13   : > { %317 = vrot.lane.b32.xlu1 %v282_v2, %s1850_s30  ;;  %313 = vrot.lane.b32.xlu0 %v280_v3, %s1850_s30  ;;  %v1947_v14 = vld [vmem:[%s1918_s29 + $0x68] sm:$0xff]  ;;  %v1950_v15 = vld [vmem:[%s1918_s29 + $0x60] sm:$0xff]  ;;  %s1861_s29 = smov 56  }
  0x17   : > { %341 = vrot.lane.b32.xlu1 %v1925_v4, %s1850_s30  ;;  %339 = vrot.lane.b32.xlu0 %v1928_v5, %s1850_s30 }
  0x1b   : > { %321 = vrot.lane.b32.xlu1 %v284_v6, %s1850_s30  ;;  %319 = vrot.lane.b32.xlu0 %v283_v7, %s1850_s30 }
  0x1f   : > { %325 = vrot.lane.b32.xlu1 %v286_v8, %s1850_s30  ;;  %323 = vrot.lane.b32.xlu0 %v285_v9, %s1850_s30 }
  0x23   : > { %329 = vrot.lane.b32.xlu1 %v288_v10, %s1850_s30  ;;  %327 = vrot.lane.b32.xlu0 %v287_v11, %s1850_s30 }
  0x27   : > { %333 = vrot.lane.b32.xlu1 %v1939_v12, %s1850_s30  ;;  %331 = vrot.lane.b32.xlu0 %v1942_v13, %s1850_s30 }
  0x2b   : > { %337 = vrot.lane.b32.xlu1 %v1947_v14, %s1850_s30  ;;  %335 = vrot.lane.b32.xlu0 %v1950_v15, %s1850_s30 }
  0x2f   : > { %547 = vrot.lane.b32.xlu0 %v1851_v16, %s1852_s8 }
  0x33   : > { %579 = vrot.lane.b32.xlu0 %v1851_v16, %s1853_s9 }
  0x81   : > { %v316_v17 = vpop.permute.xlu1 %315  ;;  %v312_v18 = vpop.permute.xlu0 %311 }
  0x82   : > { %v359_v21 = vmax.f32 %v279_v1, %v312_v18  ;;  %v361_v27 = vmax.f32 %v281_v0, %v316_v17  ;;  %v870_v17 = vld [vmem:[%s2724_s1 + $0x18] sm:$0xff]  ;;  %v869_v18 = vld [vmem:[%s2724_s1 + $0x10] sm:$0xff] }
  0x85   : > { %v318_v19 = vpop.permute.xlu1 %317  ;;  %v314_v20 = vpop.permute.xlu0 %313 }
  0x86   : > { %v360_v22 = vmax.f32 %v280_v3, %v314_v20  ;;  %v362_v23 = vmax.f32 %v282_v2, %v318_v19 }
  0x88   : > { %v1958_v24 = vmax.f32 %v359_v21, %v360_v22  ;;  %v1964_v28 = vmax.f32 %v361_v27, %v362_v23  ;;  %v868_v21 = vld [vmem:[%s2724_s1 + $0x8] sm:$0xff]  ;;  %v867_v23 = vld [vmem:[%s2724_s1] sm:$0xff] }
  0x89   : > { %v342_v25 = vpop.permute.xlu1 %341  ;;  %v340_v26 = vpop.permute.xlu0 %339 }
  0x8a   : > { %643 = vrot.lane.b32.xlu0 %v1958_v24, %s1854_s10  ;;  %549 = vrot.lane.b32.xlu1 %v1958_v24, %s1852_s8  ;;  %v374_v46 = vmax.f32 %v1925_v4, %v342_v25  ;;  %v373_v47 = vmax.f32 %v1928_v5, %v340_v26  ;;  %v442_v58 = vrot.slane %v1958_v24, 1  ;;  %v443_v59 = vrot.slane %v1964_v28, 1 }
  0x8b   : > { %v392_v62 = vrot.slane %v1958_v24, 7  ;;  %v393_v1 = vrot.slane %v1964_v28, 7 }
  0x8c   : > { %v1996_v53 = vmax.f32 %v373_v47, %v374_v46  ;;  %v457_v63 = vsel %vm450_vm0, %v442_v58, %v443_v59 }
  0x8d   : > { %v322_v29 = vpop.permute.xlu1 %321  ;;  %v320_v30 = vpop.permute.xlu0 %319  ;;  %v468_v3 = vsel %vm450_vm0, %v457_v63, 0.0  ;;  %v407_v5 = vsel %vm400_vm1, %v392_v62, %v393_v1 }
  0x8e   : > { %v364_v31 = vmax.f32 %v284_v6, %v322_v29  ;;  %v363_v32 = vmax.f32 %v283_v7, %v320_v30  ;;  %645 = vrot.lane.b32.xlu0 %v1964_v28, %s1854_s10  ;;  %551 = vrot.lane.b32.xlu1 %v1964_v28, %s1852_s8  ;;  %v399_v60 = vrot.slane %v1996_v53, 7 }
  0x90   : > { %v1970_v33 = vmax.f32 %v363_v32, %v364_v31  ;;  %v408_v0 = vsel %vm400_vm1, %v399_v60, %v392_v62 }
  0x91   : > { %v326_v34 = vpop.permute.xlu1 %325  ;;  %v324_v35 = vpop.permute.xlu0 %323  ;;  %v2039_v4 = vsel %vm417_vm2, %v408_v0, 0.0 }
  0x92   : > { %739 = vrot.lane.b32.xlu1 %v1964_v28, %s1855_s11  ;;  %553 = vrot.lane.b32.xlu0 %v1970_v33, %s1852_s8  ;;  %v366_v36 = vmax.f32 %v286_v8, %v326_v34  ;;  %v365_v37 = vmax.f32 %v285_v9, %v324_v35  ;;  %v444_v2 = vrot.slane %v1970_v33, 1  ;;  %v2051_v8 = vsel %vm417_vm2, %v407_v5, 0.0 }
  0x94   : > { %v1980_v40 = vmax.f32 %v365_v37, %v366_v36  ;;  %v456_v6 = vsel %vm450_vm0, %v443_v59, %v444_v2 }
  0x95   : > { %v330_v38 = vpop.permute.xlu1 %329  ;;  %v328_v39 = vpop.permute.xlu0 %327  ;;  %v469_v9 = vsel %vm450_vm0, %v456_v6, 0.0 }
  0x96   : > { %647 = vrot.lane.b32.xlu1 %v1970_v33, %s1854_s10  ;;  %741 = vrot.lane.b32.xlu0 %v1970_v33, %s1855_s11  ;;  %v368_v41 = vmax.f32 %v288_v10, %v330_v38  ;;  %v367_v42 = vmax.f32 %v287_v11, %v328_v39  ;;  %v445_v7 = vrot.slane %v1980_v40, 1  ;;  %v871_v10 = vld [vmem:[%s2724_s1 + $0x20] sm:$0xf]  ;;  %v449_v39 = vrot.slane %v1996_v53, 1 }
  0x97   : > { %1768 = vmatprep.subr.msk.mxu0 %vm897_vm3, %v871_v10 }
  0x98   : > { %v1986_v45 = vmax.f32 %v367_v42, %v368_v41  ;;  %v455_v11 = vsel %vm450_vm0, %v444_v2, %v445_v7  ;;  %1769 = vmatpush3.msk.msra.mxu0 %vm897_vm3, %v871_v10 }
  0x99   : > { %v334_v43 = vpop.permute.xlu1 %333  ;;  %v332_v44 = vpop.permute.xlu0 %331  ;;  %1770 = vmatprep.subr.mxu0 %v870_v17 }
  0x9a   : > { %649 = vrot.lane.b32.xlu1 %v1980_v40, %s1854_s10  ;;  %555 = vrot.lane.b32.xlu0 %v1980_v40, %s1852_s8  ;;  %v370_v49 = vmax.f32 %v1939_v12, %v334_v43  ;;  %v369_v50 = vmax.f32 %v1942_v13, %v332_v44  ;;  %v394_v12 = vrot.slane %v1970_v33, 7  ;;  %v470_v13 = vsel %vm450_vm0, %v455_v11, 0.0 }
  0x9b   : > { %1771 = vmatpush3.msra.mxu0 %v870_v17  ;;  %v446_v25 = vrot.slane %v1986_v45, 1  ;;  %v396_v30 = vrot.slane %v1986_v45, 7 }
  0x9c   : > { %v2004_v55 = vmax.f32 %v369_v50, %v370_v49  ;;  %1772 = vmatprep.subr.mxu0 %v869_v18  ;;  %v458_v49 = vsel %vm450_vm0, %v449_v39, %v442_v58 }
  0x9d   : > { %v338_v51 = vpop.permute.xlu1 %337  ;;  %v336_v52 = vpop.permute.xlu0 %335  ;;  %1773 = vmatpush3.msra.mxu0 %v869_v18  ;;  %v454_v26 = vsel %vm450_vm0, %v445_v7, %v446_v25 }
  0x9e   : > { %743 = vrot.lane.b32.xlu1 %v1980_v40, %s1855_s11  ;;  %557 = vrot.lane.b32.xlu0 %v1986_v45, %s1852_s8  ;;  %v372_v56 = vmax.f32 %v1947_v14, %v338_v51  ;;  %v371_v57 = vmax.f32 %v1950_v15, %v336_v52  ;;  %v406_v14 = vsel %vm400_vm1, %v393_v1, %v394_v12  ;;  %v395_v15 = vrot.slane %v1980_v40, 7 }
  0x9f   : > { %v2079_v19 = vsel %vm417_vm2, %v406_v14, 0.0  ;;  %1774 = vmatprep.subr.mxu0 %v868_v21  ;;  %v447_v27 = vrot.slane %v2004_v55, 1  ;;  %v471_v28 = vsel %vm450_vm0, %v454_v26, 0.0  ;;  %v397_v33 = vrot.slane %v2004_v55, 7 }
  0xa0   : > { %v2016_v61 = vmax.f32 %v371_v57, %v372_v56  ;;  %v405_v20 = vsel %vm400_vm1, %v394_v12, %v395_v15  ;;  %1775 = vmatpush3.msra.mxu0 %v868_v21  ;;  %v404_v32 = vsel %vm400_vm1, %v395_v15, %v396_v30  ;;  %v490_v51 = vsel %vm450_vm0, %v458_v49, 0.0 }
  0xa1   : > { %v2091_v22 = vsel %vm417_vm2, %v405_v20, 0.0  ;;  %1776 = vmatprep.subr.mxu0 %v867_v23  ;;  %v453_v29 = vsel %vm450_vm0, %v446_v25, %v447_v27  ;;  %v2123_v34 = vsel %vm417_vm2, %v404_v32, 0.0  ;;  %v403_v35 = vsel %vm400_vm1, %v396_v30, %v397_v33  ;;  %v548_v48 = vpop.permute.xlu0 %547 }
  0xa2   : > { %651 = vrot.lane.b32.xlu1 %v1986_v45, %s1854_s10  ;;  %745 = vrot.lane.b32.xlu0 %v1986_v45, %s1855_s11  ;;  %v472_v31 = vsel %vm450_vm0, %v453_v29, 0.0  ;;  %v2132_v36 = vsel %vm417_vm2, %v403_v35, 0.0  ;;  %v448_v37 = vrot.slane %v2016_v61, 1  ;;  %v398_v42 = vrot.slane %v2016_v61, 7 }
  0xa3   : > { %1777 = vmatpush3.msra.mxu0 %v867_v23  ;;  %v796_v15 = vsel %vm795_vm4, 0.0, %v548_v48 }
  0xa4   : > { %v452_v38 = vsel %vm450_vm0, %v447_v27, %v448_v37  ;;  %v451_v41 = vsel %vm450_vm0, %v448_v37, %v449_v39  ;;  %v402_v44 = vsel %vm400_vm1, %v397_v33, %v398_v42  ;;  %v401_v46 = vsel %vm400_vm1, %v398_v42, %v399_v60 }
  0xa5   : > { %v473_v40 = vsel %vm450_vm0, %v452_v38, 0.0  ;;  %v474_v43 = vsel %vm450_vm0, %v451_v41, 0.0  ;;  %v433_v45 = vsel %vm417_vm2, %v402_v44, 0.0  ;;  %v482_v47 = vsel %vm417_vm2, %v401_v46, 0.0  ;;  %v580_v50 = vpop.permute.xlu0 %579 }
  0xa6   : > { %653 = vrot.lane.b32.xlu1 %v2004_v55, %s1854_s10  ;;  %559 = vrot.lane.b32.xlu0 %v2004_v55, %s1852_s8  ;;  %v805_v20 = vsel %vm804_vm5, %v796_v15, %v580_v50 }
  0xaa   : > { %747 = vrot.lane.b32.xlu1 %v2004_v55, %s1855_s11  ;;  %561 = vrot.lane.b32.xlu0 %v2016_v61, %s1852_s8 }
  0xae   : > { %581 = vrot.lane.b32.xlu1 %v468_v3, %s1853_s9  ;;  %611 = vrot.lane.b32.xlu0 %v2039_v4, %s1856_s12 }
  0xb2   : > { %613 = vrot.lane.b32.xlu1 %v2051_v8, %s1856_s12  ;;  %677 = vrot.lane.b32.xlu0 %v469_v9, %s1857_s15 }
  0xb6   : > { %675 = vrot.lane.b32.xlu1 %v468_v3, %s1857_s15  ;;  %585 = vrot.lane.b32.xlu0 %v470_v13, %s1853_s9 }
  0xba   : > { %583 = vrot.lane.b32.xlu1 %v469_v9, %s1853_s9  ;;  %709 = vrot.lane.b32.xlu0 %v2079_v19, %s1858_s20 }
  0xbe   : > { %707 = vrot.lane.b32.xlu1 %v2051_v8, %s1858_s20  ;;  %617 = vrot.lane.b32.xlu0 %v2091_v22, %s1856_s12 }
  0xc2   : > { %615 = vrot.lane.b32.xlu1 %v2079_v19, %s1856_s12  ;;  %679 = vrot.lane.b32.xlu0 %v470_v13, %s1857_s15 }
  0xc6   : > { %771 = vrot.lane.b32.xlu1 %v469_v9, %s1859_s27  ;;  %681 = vrot.lane.b32.xlu0 %v471_v28, %s1857_s15 }
  0xca   : > { %773 = vrot.lane.b32.xlu1 %v470_v13, %s1859_s27  ;;  %589 = vrot.lane.b32.xlu0 %v472_v31, %s1853_s9 }
  0xce   : > { %587 = vrot.lane.b32.xlu1 %v471_v28, %s1853_s9  ;;  %713 = vrot.lane.b32.xlu0 %v2123_v34, %s1858_s20 }
  0xd2   : > { %711 = vrot.lane.b32.xlu1 %v2091_v22, %s1858_s20  ;;  %621 = vrot.lane.b32.xlu0 %v2132_v36, %s1856_s12 }
  0xd6   : > { %619 = vrot.lane.b32.xlu1 %v2123_v34, %s1856_s12  ;;  %683 = vrot.lane.b32.xlu0 %v472_v31, %s1857_s15 }
  0xda   : > { %775 = vrot.lane.b32.xlu1 %v471_v28, %s1859_s27  ;;  %685 = vrot.lane.b32.xlu0 %v473_v40, %s1857_s15 }
  0xde   : > { %777 = vrot.lane.b32.xlu1 %v472_v31, %s1859_s27  ;;  %593 = vrot.lane.b32.xlu0 %v474_v43, %s1853_s9 }
  0xe2   : > { %591 = vrot.lane.b32.xlu1 %v473_v40, %s1853_s9  ;;  %717 = vrot.lane.b32.xlu0 %v433_v45, %s1858_s20 }
  0xe6   : > { %715 = vrot.lane.b32.xlu1 %v2132_v36, %s1858_s20  ;;  %625 = vrot.lane.b32.xlu0 %v482_v47, %s1856_s12 }
  0xea   : > { %623 = vrot.lane.b32.xlu1 %v433_v45, %s1856_s12  ;;  %749 = vrot.lane.b32.xlu0 %v2016_v61, %s1855_s11 }
  0xee   : > { %655 = vrot.lane.b32.xlu1 %v2016_v61, %s1854_s10  ;;  %657 = vrot.lane.b32.xlu0 %v1996_v53, %s1854_s10 }
  0xf2   : > { %779 = vrot.lane.b32.xlu1 %v473_v40, %s1859_s27  ;;  %781 = vrot.lane.b32.xlu0 %v474_v43, %s1859_s27 }
  0xf6   : > { %687 = vrot.lane.b32.xlu1 %v474_v43, %s1857_s15  ;;  %719 = vrot.lane.b32.xlu0 %v482_v47, %s1858_s20 }
  0xfa   : > { %689 = vrot.lane.b32.xlu1 %v490_v51, %s1857_s15  ;;  %751 = vrot.lane.b32.xlu0 %v1996_v53, %s1855_s11 }
  0xfc   : > { %v550_v52 = vpop.permute.xlu1 %549  ;;  %v644_v55 = vpop.permute.xlu0 %643 }
  0xfd   : > { %v797_v21 = vsel %vm795_vm4, %v2039_v4, %v550_v52 }
  0xfe   : > { %721 = vrot.lane.b32.xlu1 %v1851_v16, %s1858_s20  ;;  %783 = vrot.lane.b32.xlu0 %v490_v51, %s1859_s27 }
 0x100   : > { %v2194_v24 = vpop.permute.xlu1 %551  ;;  %v646_v56 = vpop.permute.xlu0 %645 }
 0x101   : > { %v798_v46 = vsel %vm795_vm4, %v2051_v8, %v2194_v24 }
 0x102   : > { %753 = vrot.lane.b32.xlu1 %v1851_v16, %s1855_s11  ;;  %1148 = vrot.lane.b32.xlu0 %v1851_v16, %s1853_s9 }
 0x104   : > { %v740_v57 = vpop.permute.xlu1 %739  ;;  %v2200_v58 = vpop.permute.xlu0 %553 }
 0x106   : > { %785 = vrot.lane.b32.xlu1 %v1851_v16, %s1859_s27  ;;  %1180 = vrot.lane.b32.xlu0 %v1851_v16, %s1854_s10 }
 0x108   : > { %v2206_v53 = vpop.permute.xlu1 %647  ;;  %v742_v59 = vpop.permute.xlu0 %741 }
 0x10a   : > { %1322 = vrot.lane.b32.xlu1 %v1851_v16, %s1860_s28 }
 0x10c   : > { %v2210_v60 = vpop.permute.xlu1 %649  ;;  %v2212_v61 = vpop.permute.xlu0 %555 }
 0x10e   : > { %1354 = vrot.lane.b32.xlu1 %v1851_v16, %s1861_s29 }
 0x110   : > { %v2214_v62 = vpop.permute.xlu1 %743  ;;  %v2216_v63 = vpop.permute.xlu0 %557 }
 0x114   : > { %v2218_v0 = vpop.permute.xlu1 %651  ;;  %v2220_v1 = vpop.permute.xlu0 %745 }
 0x118   : > { %v2222_v2 = vpop.permute.xlu1 %653  ;;  %v2224_v3 = vpop.permute.xlu0 %559 }
 0x11c   : > { %v2226_v5 = vpop.permute.xlu1 %747  ;;  %v562_v6 = vpop.permute.xlu0 %561 }
 0x11d   : > { %v2229_v7 = vsel %vm795_vm4, %v433_v45, %v562_v6 }
 0x120   : > { %v582_v9 = vpop.permute.xlu1 %581  ;;  %v612_v10 = vpop.permute.xlu0 %611 }
 0x121   : > { %v814_v23 = vsel %vm813_vm6, %v805_v20, %v612_v10  ;;  %v806_v27 = vsel %vm804_vm5, %v797_v21, %v582_v9 }
 0x122   : > { %v823_v29 = vsel %vm822_vm7, %v814_v23, %v644_v55 }
 0x124   : > { %v614_v11 = vpop.permute.xlu1 %613  ;;  %v678_v12 = vpop.permute.xlu0 %677 }
 0x125   : > { %v815_v28 = vsel %vm813_vm6, %v806_v27, %v614_v11 }
 0x126   : > { %v824_v33 = vsel %vm822_vm7, %v815_v28, %v646_v56  ;;  %v799_v56 = vsel %vm795_vm4, %v2079_v19, %v2200_v58  ;;  %v801_v28 = vsel %vm795_vm4, %v2123_v34, %v2216_v63 }
 0x127   : > { %v833_v35 = vsel %vm831_vm8, %v824_v33, %v678_v12 }
 0x128   : > { %v676_v13 = vpop.permute.xlu1 %675  ;;  %v586_v14 = vpop.permute.xlu0 %585 }
 0x129   : > { %v832_v30 = vsel %vm831_vm8, %v823_v29, %v676_v13 }
 0x12c   : > { %v584_v17 = vpop.permute.xlu1 %583  ;;  %v710_v18 = vpop.permute.xlu0 %709 }
 0x12d   : > { %v842_v40 = vsel %vm840_vm9, %v833_v35, %v710_v18  ;;  %v807_v49 = vsel %vm804_vm5, %v798_v46, %v584_v17 }
 0x12e   : > { %v851_v43 = vsel %vm849_vm11, %v842_v40, %v742_v59 }
 0x130   : > { %v708_v25 = vpop.permute.xlu1 %707  ;;  %v618_v26 = vpop.permute.xlu0 %617 }
 0x131   : > { %v841_v4 = vsel %vm840_vm9, %v832_v30, %v708_v25 }
 0x132   : > { %v850_v39 = vsel %vm849_vm11, %v841_v4, %v740_v57  ;;  %v808_v57 = vsel %vm804_vm5, %v799_v56, %v586_v14 }
 0x133   : > { %v817_v59 = vsel %vm813_vm6, %v808_v57, %v618_v26 }
 0x134   : > { %v616_v31 = vpop.permute.xlu1 %615  ;;  %v680_v32 = vpop.permute.xlu0 %679  ;;  %v826_v10 = vsel %vm822_vm7, %v817_v59, %v2210_v60 }
 0x135   : > { %v816_v50 = vsel %vm813_vm6, %v807_v49, %v616_v31 }
 0x136   : > { %v825_v55 = vsel %vm822_vm7, %v816_v50, %v2206_v53 }
 0x137   : > { %v834_v8 = vsel %vm831_vm8, %v825_v55, %v680_v32 }
 0x138   : > { %v772_v37 = vpop.permute.xlu1 %771  ;;  %v682_v38 = vpop.permute.xlu0 %681 }
 0x139   : > { %v859_v41 = vsel %vm858_vm10, %v850_v39, %v772_v37  ;;  %v835_v11 = vsel %vm831_vm8, %v826_v10, %v682_v38  ;;  %v2331_v10 = vld [vmem:[%s2726_s3] ss:$0 sm:$0xff] }
 0x13a   : > { %1778 = vmatprep.mubr.msk.f32.mxu0 %vm872_vm12, %v859_v41 }
 0x13c   : > { %v774_v42 = vpop.permute.xlu1 %773  ;;  %v590_v44 = vpop.permute.xlu0 %589 }
 0x13d   : > { %v860_v45 = vsel %vm858_vm10, %v851_v43, %v774_v42  ;;  %v810_v31 = vsel %vm804_vm5, %v801_v28, %v590_v44 }
 0x13e   : > { %1779 = vmatmul.mubr.msk.f32.vlgmr.msra.gmra.mxu0 %vm872_vm12, %v860_v45 }
 0x140   : > { %v588_v47 = vpop.permute.xlu1 %587  ;;  %v714_v48 = vpop.permute.xlu0 %713 }
 0x141   : > { %v844_v58 = vsel %vm840_vm9, %v835_v11, %v714_v48 }
 0x142   : > { %v853_v15 = vsel %vm849_vm11, %v844_v58, %v2220_v1 }
 0x144   : > { %v712_v51 = vpop.permute.xlu1 %711  ;;  %v622_v52 = vpop.permute.xlu0 %621 }
 0x145   : > { %v843_v9 = vsel %vm840_vm9, %v834_v8, %v712_v51 }
 0x146   : > { %v852_v12 = vsel %vm849_vm11, %v843_v9, %v2214_v62  ;;  %v800_v62 = vsel %vm795_vm4, %v2091_v22, %v2212_v61  ;;  %v819_v61 = vsel %vm813_vm6, %v810_v31, %v622_v52 }
 0x147   : > { %v809_v26 = vsel %vm804_vm5, %v800_v62, %v588_v47  ;;  %v828_v4 = vsel %vm822_vm7, %v819_v61, %v2222_v2  ;;  %v802_v2 = vsel %vm795_vm4, %v2132_v36, %v2224_v3 }
 0x148   : > { %v620_v24 = vpop.permute.xlu1 %619  ;;  %v684_v6 = vpop.permute.xlu0 %683 }
 0x149   : > { %v818_v27 = vsel %vm813_vm6, %v809_v26, %v620_v24 }
 0x14a   : > { %v827_v22 = vsel %vm822_vm7, %v818_v27, %v2218_v0 }
 0x14c   : > { %v776_v53 = vpop.permute.xlu1 %775  ;;  %v686_v19 = vpop.permute.xlu0 %685 }
 0x14d   : > { %v861_v13 = vsel %vm858_vm10, %v852_v12, %v776_v53  ;;  %v837_v34 = vsel %vm831_vm8, %v828_v4, %v686_v19 }
 0x14e   : > { %1781 = vmatprep.mubr.msk.f32.mxu0 %vm872_vm12, %v861_v13 }
 0x150   : > { %v778_v14 = vpop.permute.xlu1 %777  ;;  %v594_v17 = vpop.permute.xlu0 %593 }
 0x151   : > { %v862_v60 = vsel %vm858_vm10, %v853_v15, %v778_v14  ;;  %v812_v21 = vsel %vm804_vm5, %v2229_v7, %v594_v17  ;;  %v836_v7 = vsel %vm831_vm8, %v827_v22, %v684_v6  ;;  %v2326_v6 = vld [vmem:[%s2725_s2] ss:$0 sm:$0xff] }
 0x152   : > { %1782 = vmatmul.mubr.msk.f32.gmra.mxu0 %vm872_vm12, %v862_v60 }
 0x154   : > { %v592_v18 = vpop.permute.xlu1 %591  ;;  %v718_v20 = vpop.permute.xlu0 %717 }
 0x155   : > { %v846_v63 = vsel %vm840_vm9, %v837_v34, %v718_v20  ;;  %v811_v44 = vsel %vm804_vm5, %v802_v2, %v592_v18 }
 0x158   : > { %v716_v23 = vpop.permute.xlu1 %715  ;;  %v626_v25 = vpop.permute.xlu0 %625 }
 0x159   : > { %v821_v1 = vsel %vm813_vm6, %v812_v21, %v626_v25  ;;  %v845_v35 = vsel %vm840_vm9, %v836_v7, %v716_v23 }
 0x15a   : > { %v854_v0 = vsel %vm849_vm11, %v845_v35, %v2226_v5 }
 0x15c   : > { %v624_v29 = vpop.permute.xlu1 %623  ;;  %v750_v30 = vpop.permute.xlu0 %749 }
 0x15d   : > { %v855_v37 = vsel %vm849_vm11, %v846_v63, %v750_v30  ;;  %v820_v45 = vsel %vm813_vm6, %v811_v44, %v624_v29 }
 0x160   : > { %v656_v32 = vpop.permute.xlu1 %655  ;;  %v658_v33 = vpop.permute.xlu0 %657 }
 0x161   : > { %v829_v5 = vsel %vm822_vm7, %v820_v45, %v656_v32  ;;  %v830_v46 = vsel %vm822_vm7, %v821_v1, %v658_v33 }
 0x164   : > { %v780_v38 = vpop.permute.xlu1 %779  ;;  %v782_v39 = vpop.permute.xlu0 %781 }
 0x165   : > { %v863_v40 = vsel %vm858_vm10, %v854_v0, %v780_v38  ;;  %v864_v41 = vsel %vm858_vm10, %v855_v37, %v782_v39 }
 0x166   : > { %1784 = vmatprep.mubr.msk.f32.mxu0 %vm872_vm12, %v863_v40 }
 0x167   : > { %1785 = vmatmul.mubr.msk.f32.gmra.mxu0 %vm872_vm12, %v864_v41 }
 0x168   : > { %v688_v42 = vpop.permute.xlu1 %687  ;;  %v720_v43 = vpop.permute.xlu0 %719 }
 0x169   : > { %v838_v47 = vsel %vm831_vm8, %v829_v5, %v688_v42 }
 0x16a   : > { %v847_v51 = vsel %vm840_vm9, %v838_v47, %v720_v43 }
 0x16c   : > { %v690_v48 = vpop.permute.xlu1 %689  ;;  %v752_v49 = vpop.permute.xlu0 %751 }
 0x16d   : > { %v839_v50 = vsel %vm831_vm8, %v830_v46, %v690_v48  ;;  %v856_v36 = vsel %vm849_vm11, %v847_v51, %v752_v49 }
 0x170   : > { %v722_v3 = vpop.permute.xlu1 %721  ;;  %v784_v52 = vpop.permute.xlu0 %783 }
 0x171   : > { %v865_v55 = vsel %vm858_vm10, %v856_v36, %v784_v52  ;;  %v848_v56 = vsel %vm840_vm9, %v839_v50, %v722_v3 }
 0x172   : > { %1787 = vmatprep.mubr.msk.f32.mxu0 %vm872_vm12, %v865_v55 }
 0x174   : > { %v754_v57 = vpop.permute.xlu1 %753 }
 0x175   : > { %v857_v59 = vsel %vm849_vm11, %v848_v56, %v754_v57 }
 0x178   : > { %v786_v8 = vpop.permute.xlu1 %785 }
 0x179   : > { %v866_v24 = vsel %vm858_vm10, %v857_v59, %v786_v8 }
 0x17a   : > { %1788 = vmatmul.mubr.msk.f32.gmra.mxu0 %vm872_vm12, %v866_v24 }
 0x1fe   : > { %v1780_v9 = vpop.f32.mrf.mxu0 }
 0x1ff   : > { %v1014_v11 = vmul.f32 %v1780_v9, %v2326_v6 }
 0x200   : > { %v967_v53 = vpop.f32.mrf.mxu0 }
 0x201   : > { %v1029_v12 = vadd.f32 %v2331_v10, %v1014_v11  ;;  %v1013_v19 = vmul.f32 %v2326_v6, %v967_v53 }
 0x203   : > { %v1037_v58 = vmax.f32 %v1029_v12, 0.0  ;;  %v1028_v13 = vadd.f32 %v2331_v10, %v1013_v19 }
 0x205   : > { %1246 = vrot.lane.b32.xlu0 %v1037_v58, %s1859_s27  ;;  %1152 = vrot.lane.b32.xlu1 %v1037_v58, %s1853_s9  ;;  %v2339_v14 = vmax.f32 %v1028_v13, 0.0  ;;  %v1077_v26 = vrot.slane %v1037_v58, 1  ;;  %v1045_v28 = vrot.slane %v1037_v58, 7 }
 0x207   : > { %v1076_v23 = vrot.slane %v2339_v14, 1  ;;  %v1044_v27 = vrot.slane %v2339_v14, 7 }
 0x209   : > { %1340 = vrot.lane.b32.xlu1 %v1037_v58, %s1861_s29  ;;  %1244 = vrot.lane.b32.xlu0 %v2339_v14, %s1859_s27  ;;  %v1090_v1 = vsel %vm450_vm0, %v1076_v23, %v1077_v26  ;;  %v1058_v30 = vsel %vm400_vm1, %v1044_v27, %v1045_v28 }
 0x20a   : > { %v1093_v29 = vsel %vm450_vm0, %v1090_v1, 0.0  ;;  %v2371_v31 = vsel %vm417_vm2, %v1058_v30, 0.0  ;;  %v1464_v1 = vld [vmem:[%s2727_s4] sm:$0xff] }
 0x20d   : > { %1150 = vrot.lane.b32.xlu1 %v2339_v14, %s1853_s9  ;;  %v1472_v14 = vld [vmem:[%s2727_s4 + $0x40] sm:$0xff] }
 0x20e   : > { %1790 = vmatprep.subr.mxu1 %v1472_v14 }
 0x20f   : > { %1791 = vmatpush3.msra.mxu1 %v1472_v14 }
 0x212   : > { %v1783_v15 = vpop.f32.mrf.mxu0 }
 0x213   : > { %v1016_v17 = vmul.f32 %v1783_v15, %v2326_v6  ;;  %v1471_v15 = vld [vmem:[%s2727_s4 + $0x38] sm:$0xff] }
 0x214   : > { %v977_v60 = vpop.f32.mrf.mxu0  ;;  %1792 = vmatprep.subr.mxu1 %v1471_v15 }
 0x215   : > { %v1031_v18 = vadd.f32 %v2331_v10, %v1016_v17  ;;  %v1015_v20 = vmul.f32 %v2326_v6, %v977_v60  ;;  %v1470_v60 = vld [vmem:[%s2727_s4 + $0x30] sm:$0xff]  ;;  %1793 = vmatpush3.msra.mxu1 %v1471_v15 }
 0x216   : > { %1794 = vmatprep.subr.mxu1 %v1470_v60 }
 0x217   : > { %v2349_v62 = vmax.f32 %v1031_v18, 0.0  ;;  %v1030_v21 = vadd.f32 %v2331_v10, %v1015_v20  ;;  %v1469_v20 = vld [vmem:[%s2727_s4 + $0x28] sm:$0xff]  ;;  %1795 = vmatpush3.msra.mxu1 %v1470_v60 }
 0x218   : > { %1796 = vmatprep.subr.mxu1 %v1469_v20 }
 0x219   : > { %1250 = vrot.lane.b32.xlu1 %v2349_v62, %s1859_s27  ;;  %1156 = vrot.lane.b32.xlu0 %v2349_v62, %s1853_s9  ;;  %v1038_v25 = vmax.f32 %v1030_v21, 0.0  ;;  %v1079_v37 = vrot.slane %v2349_v62, 1  ;;  %v1047_v2 = vrot.slane %v2349_v62, 7 }
 0x21a   : > { %1797 = vmatpush3.msra.mxu1 %v1469_v20 }
 0x21b   : > { %v1078_v4 = vrot.slane %v1038_v25, 1  ;;  %v1046_v39 = vrot.slane %v1038_v25, 7 }
 0x21d   : > { %1344 = vrot.lane.b32.xlu1 %v2349_v62, %s1861_s29  ;;  %1154 = vrot.lane.b32.xlu0 %v1038_v25, %s1853_s9  ;;  %v1089_v63 = vsel %vm450_vm0, %v1077_v26, %v1078_v4  ;;  %v1088_v0 = vsel %vm450_vm0, %v1078_v4, %v1079_v37  ;;  %v1057_v41 = vsel %vm400_vm1, %v1045_v28, %v1046_v39  ;;  %v1468_v62 = vld [vmem:[%s2727_s4 + $0x20] sm:$0xff]  ;;  %v1465_v26 = vld [vmem:[%s2727_s4 + $0x8] sm:$0xff] }
 0x21e   : > { %v1094_v38 = vsel %vm450_vm0, %v1089_v63, 0.0  ;;  %v1095_v40 = vsel %vm450_vm0, %v1088_v0, 0.0  ;;  %v2407_v42 = vsel %vm417_vm2, %v1057_v41, 0.0  ;;  %v1056_v44 = vsel %vm400_vm1, %v1046_v39, %v1047_v2  ;;  %1798 = vmatprep.subr.mxu1 %v1468_v62 }
 0x21f   : > { %v2419_v48 = vsel %vm417_vm2, %v1056_v44, 0.0  ;;  %1799 = vmatpush3.msra.mxu1 %v1468_v62 }
 0x221   : > { %1182 = vrot.lane.b32.xlu1 %v1093_v29, %s1854_s10  ;;  %1342 = vrot.lane.b32.xlu0 %v1038_v25, %s1861_s29 }
 0x225   : > { %1214 = vrot.lane.b32.xlu1 %v2371_v31, %s1858_s20 }
 0x227   : > { %v1786_v22 = vpop.f32.mrf.mxu0 }
 0x228   : > { %v1018_v61 = vmul.f32 %v1786_v22, %v2326_v6 }
 0x229   : > { %1276 = vrot.lane.b32.xlu1 %v1093_v29, %s1862_s13  ;;  %v987_v7 = vpop.f32.mrf.mxu0 }
 0x22a   : > { %v1033_v32 = vadd.f32 %v2331_v10, %v1018_v61  ;;  %v1017_v33 = vmul.f32 %v2326_v6, %v987_v7 }
 0x22c   : > { %v2379_v35 = vmax.f32 %v1033_v32, 0.0  ;;  %v1032_v34 = vadd.f32 %v2331_v10, %v1017_v33 }
 0x22d   : > { %1308 = vrot.lane.b32.xlu1 %v2371_v31, %s1860_s28 }
 0x22e   : > { %1160 = vrot.lane.b32.xlu0 %v2379_v35, %s1853_s9  ;;  %v1040_v59 = vmax.f32 %v1032_v34, 0.0  ;;  %v1081_v53 = vrot.slane %v2379_v35, 1  ;;  %v1049_v17 = vrot.slane %v2379_v35, 7 }
 0x231   : > { %1248 = vrot.lane.b32.xlu1 %v1038_v25, %s1859_s27  ;;  %v1466_v25 = vld [vmem:[%s2727_s4 + $0x10] sm:$0xff] }
 0x232   : > { %1278 = vrot.lane.b32.xlu0 %v1094_v38, %s1862_s13 }
 0x235   : > { %1254 = vrot.lane.b32.xlu1 %v2379_v35, %s1859_s27 }
 0x236   : > { %1186 = vrot.lane.b32.xlu0 %v1095_v40, %s1854_s10 }
 0x239   : > { %1348 = vrot.lane.b32.xlu1 %v2379_v35, %s1861_s29  ;;  %v2563_v35 = vpop.permute.xlu0 %1148 }
 0x23a   : > { %1310 = vrot.lane.b32.xlu0 %v2407_v42, %s1860_s28  ;;  %v1789_v43 = vpop.f32.mrf.mxu0 }
 0x23b   : > { %v1020_v45 = vmul.f32 %v1789_v43, %v2326_v6 }
 0x23c   : > { %v997_v5 = vpop.f32.mrf.mxu0 }
 0x23d   : > { %v1035_v46 = vadd.f32 %v2331_v10, %v1020_v45  ;;  %v1019_v47 = vmul.f32 %v2326_v6, %v997_v5  ;;  %1184 = vrot.lane.b32.xlu1 %v1094_v38, %s1854_s10  ;;  %v1080_v6 = vrot.slane %v1040_v59, 1 }
 0x23e   : > { %1218 = vrot.lane.b32.xlu0 %v2419_v48, %s1858_s20 }
 0x23f   : > { %v1043_v49 = vmax.f32 %v1035_v46, 0.0  ;;  %v1034_v50 = vadd.f32 %v2331_v10, %v1019_v47  ;;  %v1087_v9 = vsel %vm450_vm0, %v1079_v37, %v1080_v6  ;;  %v1048_v10 = vrot.slane %v1040_v59, 7  ;;  %v2571_v37 = vpop.permute.xlu0 %1180 }
 0x240   : > { %v1096_v11 = vsel %vm450_vm0, %v1087_v9, 0.0  ;;  %v1086_v19 = vsel %vm450_vm0, %v1080_v6, %v1081_v53 }
 0x241   : > { %v2424_v51 = vmax.f32 %v1034_v50, 0.0  ;;  %1216 = vrot.lane.b32.xlu1 %v2407_v42, %s1858_s20  ;;  %v1083_v36 = vrot.slane %v1043_v49, 1  ;;  %v1051_v3 = vrot.slane %v1043_v49, 7  ;;  %v1055_v12 = vsel %vm400_vm1, %v1047_v2, %v1048_v10 }
 0x242   : > { %1280 = vrot.lane.b32.xlu0 %v1095_v40, %s1862_s13  ;;  %v2473_v58 = vsel %vm417_vm2, %v1055_v12, 0.0  ;;  %v1097_v13 = vsel %vm450_vm0, %v1086_v19, 0.0  ;;  %v1054_v18 = vsel %vm400_vm1, %v1048_v10, %v1049_v17 }
 0x243   : > { %v2431_v52 = vsel %vm450_vm0, %v1083_v36, %v1076_v23  ;;  %v1082_v55 = vrot.slane %v2424_v51, 1  ;;  %v2436_v56 = vsel %vm400_vm1, %v1051_v3, %v1044_v27  ;;  %v1050_v57 = vrot.slane %v2424_v51, 7  ;;  %v1467_v23 = vld [vmem:[%s2727_s4 + $0x18] sm:$0xff]  ;;  %v2527_v27 = vpop.permute.xlu1 %1322 }
 0x244   : > { %v2504_v21 = vsel %vm417_vm2, %v1054_v18, 0.0  ;;  %1800 = vmatprep.subr.mxu1 %v1467_v23  ;;  %v1115_v28 = vsel %vm450_vm0, %v2431_v52, 0.0  ;;  %v1061_v22 = vsel %vm417_vm2, %v2436_v56, 0.0 }
 0x245   : > { %1372 = vrot.lane.b32.xlu1 %v1094_v38, %s1863_s14  ;;  %v2444_v8 = vsel %vm450_vm0, %v1082_v55, %v1083_v36  ;;  %v2450_v24 = vsel %vm400_vm1, %v1050_v57, %v1051_v3  ;;  %1801 = vmatpush3.msra.mxu1 %v1467_v23  ;;  %v1085_v29 = vsel %vm450_vm0, %v1081_v53, %v1082_v55 }
 0x246   : > { %1158 = vrot.lane.b32.xlu0 %v1040_v59, %s1853_s9  ;;  %1802 = vmatprep.subr.mxu1 %v1466_v25  ;;  %v1098_v30 = vsel %vm450_vm0, %v1085_v29, 0.0  ;;  %v1053_v7 = vsel %vm400_vm1, %v1049_v17, %v1050_v57  ;;  %v1099_v4 = vsel %vm450_vm0, %v2444_v8, 0.0  ;;  %v1107_v0 = vsel %vm417_vm2, %v2450_v24, 0.0 }
 0x247   : > { %1803 = vmatpush3.msra.mxu1 %v1466_v25  ;;  %v2545_v61 = vpop.permute.xlu1 %1354  ;;  %v2554_v32 = vsel %vm417_vm2, %v1053_v7, 0.0  ;;  %vm1455_vm0 = vcmask 523264   ;;  %vm1473_vm1 = vcmask 588800  }
 0x248   : > { %1804 = vmatprep.subr.mxu1 %v1465_v26 }
 0x249   : > { %1374 = vrot.lane.b32.xlu1 %v1095_v40, %s1863_s14  ;;  %1805 = vmatpush3.msra.mxu1 %v1465_v26 }
 0x24a   : > { %1346 = vrot.lane.b32.xlu0 %v1040_v59, %s1861_s29  ;;  %1806 = vmatprep.subr.mxu1 %v1464_v1 }
 0x24b   : > { %1807 = vmatpush3.msra.mxu1 %v1464_v1 }
 0x24d   : > { %1312 = vrot.lane.b32.xlu1 %v2419_v48, %s1860_s28 }
 0x24e   : > { %1258 = vrot.lane.b32.xlu0 %v1043_v49, %s1859_s27 }
 0x251   : > { %1252 = vrot.lane.b32.xlu1 %v1040_v59, %s1859_s27 }
 0x252   : > { %1352 = vrot.lane.b32.xlu0 %v1043_v49, %s1861_s29 }
 0x255   : > { %1188 = vrot.lane.b32.xlu1 %v1096_v11, %s1854_s10 }
 0x256   : > { %1282 = vrot.lane.b32.xlu0 %v1096_v11, %s1862_s13 }
 0x259   : > { %1220 = vrot.lane.b32.xlu1 %v2473_v58, %s1858_s20 }
 0x25a   : > { %1190 = vrot.lane.b32.xlu0 %v1097_v13, %s1854_s10 }
 0x25d   : > { %1376 = vrot.lane.b32.xlu1 %v1096_v11, %s1863_s14 }
 0x25e   : > { %1314 = vrot.lane.b32.xlu0 %v2473_v58, %s1860_s28 }
 0x261   : > { %1378 = vrot.lane.b32.xlu1 %v1097_v13, %s1863_s14 }
 0x262   : > { %1222 = vrot.lane.b32.xlu0 %v2504_v21, %s1858_s20 }
 0x265   : > { %1316 = vrot.lane.b32.xlu1 %v2504_v21, %s1860_s28 }
 0x266   : > { %1284 = vrot.lane.b32.xlu0 %v1097_v13, %s1862_s13 }
 0x269   : > { %1256 = vrot.lane.b32.xlu1 %v2424_v51, %s1859_s27 }
 0x26a   : > { %1162 = vrot.lane.b32.xlu0 %v2424_v51, %s1853_s9 }
 0x26d   : > { %1290 = vrot.lane.b32.xlu1 %v1115_v28, %s1862_s13 }
 0x26e   : > { %1350 = vrot.lane.b32.xlu0 %v2424_v51, %s1861_s29 }
 0x271   : > { %1192 = vrot.lane.b32.xlu1 %v1098_v30, %s1854_s10 }
 0x272   : > { %1212 = vrot.lane.b32.xlu0 %v1061_v22, %s1858_s20 }
 0x275   : > { %1224 = vrot.lane.b32.xlu1 %v2554_v32, %s1858_s20 }
 0x276   : > { %1286 = vrot.lane.b32.xlu0 %v1098_v30, %s1862_s13 }
 0x277   : > { %v1153_v33 = vpop.permute.xlu1 %1152  ;;  %v1247_v39 = vpop.permute.xlu0 %1246 }
 0x278   : > { %v1398_v19 = vsel %vm804_vm5, %v2371_v31, %v1153_v33 }
 0x279   : > { %1380 = vrot.lane.b32.xlu1 %v1098_v30, %s1863_s14 }
 0x27a   : > { %1194 = vrot.lane.b32.xlu0 %v1099_v4, %s1854_s10 }
 0x27b   : > { %v2566_v34 = vpop.permute.xlu1 %1340  ;;  %v2582_v41 = vpop.permute.xlu0 %1244 }
 0x27d   : > { %1288 = vrot.lane.b32.xlu1 %v1099_v4, %s1862_s13 }
 0x27e   : > { %1318 = vrot.lane.b32.xlu0 %v2554_v32, %s1860_s28 }
 0x27f   : > { %v1151_v63 = vpop.permute.xlu1 %1150 }
 0x280   : > { %v1397_v38 = vsel %vm804_vm5, %v1061_v22, %v1151_v63 }
 0x281   : > { %1386 = vrot.lane.b32.xlu1 %v1851_v16, %s1863_s14 }
 0x282   : > { %1226 = vrot.lane.b32.xlu0 %v1107_v0, %s1858_s20 }
 0x286   : > { %1382 = vrot.lane.b32.xlu0 %v1099_v4, %s1863_s14 }
 0x28a   : > { %1320 = vrot.lane.b32.xlu0 %v1107_v0, %s1860_s28  ;;  %s1737_s28 = sshll.u32 %s2732_s25, 6 }
 0x28b   : > { %v1251_v40 = vpop.permute.xlu1 %1250  ;;  %v2585_v43 = vpop.permute.xlu0 %1156 }
 0x28e   : > { %1384 = vrot.lane.b32.xlu0 %v1115_v28, %s1863_s14  ;;  %s2702_s14 = scalar_lea.vmem %s2730_s7, %s1737_s28 }
 0x28f   : > { %v1345_v2 = vpop.permute.xlu1 %1344  ;;  %v1155_v45 = vpop.permute.xlu0 %1154 }
 0x290   : > { %v1399_v57 = vsel %vm804_vm5, %v2407_v42, %v1155_v45 }
 0x293   : > { %v1183_v54 = vpop.permute.xlu1 %1182  ;;  %v1343_v49 = vpop.permute.xlu0 %1342 }
 0x294   : > { %v1405_v44 = vsel %vm822_vm7, %v1397_v38, %v1183_v54 }
 0x297   : > { %v1215_v16 = vpop.permute.xlu1 %1214 }
 0x298   : > { %v1413_v5 = vsel %vm840_vm9, %v1405_v44, %v1215_v16 }
 0x299   : > { %v1421_v46 = vsel %vm858_vm10, %v1413_v5, %v1247_v39  ;;  %v1400_v5 = vsel %vm804_vm5, %v2419_v48, %v2585_v43 }
 0x29b   : > { %v2590_v47 = vpop.permute.xlu1 %1276 }
 0x29f   : > { %v2592_v50 = vpop.permute.xlu1 %1308 }
 0x2a0   : > { %v1161_v51 = vpop.permute.xlu0 %1160 }
 0x2a1   : > { %v2596_v36 = vsel %vm804_vm5, %v2504_v21, %v1161_v51 }
 0x2a3   : > { %v1249_v3 = vpop.permute.xlu1 %1248 }
 0x2a4   : > { %v1279_v52 = vpop.permute.xlu0 %1278 }
 0x2a5   : > { %v1430_v55 = vsel %vm1428_vm13, %v1421_v46, %v1279_v52 }
 0x2a7   : > { %v2599_v56 = vpop.permute.xlu1 %1254 }
 0x2a8   : > { %v1187_v59 = vpop.permute.xlu0 %1186 }
 0x2a9   : > { %v1407_v8 = vsel %vm822_vm7, %v1399_v57, %v1187_v59 }
 0x2ab   : > { %v2604_v24 = vpop.permute.xlu1 %1348 }
 0x2ac   : > { %v1311_v6 = vpop.permute.xlu0 %1310 }
 0x2ad   : > { %v1439_v9 = vsel %vm1437_vm14, %v1430_v55, %v1311_v6 }
 0x2ae   : > { %v1448_v10 = vsel %vm1446_vm15, %v1439_v9, %v1343_v49 }
 0x2af   : > { %v1185_v11 = vpop.permute.xlu1 %1184 }
 0x2b0   : > { %v1219_v53 = vpop.permute.xlu0 %1218  ;;  %v1406_v13 = vsel %vm822_vm7, %v1398_v19, %v1185_v11 }
 0x2b1   : > { %v1415_v12 = vsel %vm840_vm9, %v1407_v8, %v1219_v53 }
 0x2b2   : > { %v1423_v42 = vsel %vm858_vm10, %v1415_v12, %v1251_v40 }
 0x2b3   : > { %v1217_v14 = vpop.permute.xlu1 %1216 }
 0x2b4   : > { %v1414_v15 = vsel %vm840_vm9, %v1406_v13, %v1217_v14  ;;  %v1281_v17 = vpop.permute.xlu0 %1280 }
 0x2b5   : > { %v1422_v60 = vsel %vm858_vm10, %v1414_v15, %v1249_v3 }
 0x2b6   : > { %v1431_v23 = vsel %vm1428_vm13, %v1422_v60, %v1281_v17 }
 0x2b7   : > { %v1373_v18 = vpop.permute.xlu1 %1372 }
 0x2b8   : > { %v1159_v20 = vpop.permute.xlu0 %1158 }
 0x2bb   : > { %v1375_v62 = vpop.permute.xlu1 %1374 }
 0x2bc   : > { %v1347_v21 = vpop.permute.xlu0 %1346 }
 0x2bf   : > { %v1313_v25 = vpop.permute.xlu1 %1312 }
 0x2c0   : > { %v1440_v26 = vsel %vm1437_vm14, %v1431_v23, %v1313_v25  ;;  %v2617_v31 = vpop.permute.xlu0 %1258 }
 0x2c1   : > { %v1449_v1 = vsel %vm1446_vm15, %v1440_v26, %v1345_v2  ;;  %v1396_v2 = vsel %vm804_vm5, 0.0, %v2563_v35 }
 0x2c2   : > { %v1404_v49 = vsel %vm822_vm7, %v1396_v2, %v2571_v37 }
 0x2c3   : > { %v1253_v28 = vpop.permute.xlu1 %1252 }
 0x2c4   : > { %v2620_v29 = vpop.permute.xlu0 %1352 }
 0x2c7   : > { %v1189_v30 = vpop.permute.xlu1 %1188 }
 0x2c8   : > { %v1283_v22 = vpop.permute.xlu0 %1282  ;;  %v1408_v51 = vsel %vm822_vm7, %v1400_v5, %v1189_v30 }
 0x2c9   : > { %v1432_v48 = vsel %vm1428_vm13, %v1423_v42, %v1283_v22 }
 0x2cb   : > { %v1221_v7 = vpop.permute.xlu1 %1220 }
 0x2cc   : > { %v1191_v33 = vpop.permute.xlu0 %1190  ;;  %v1416_v52 = vsel %vm840_vm9, %v1408_v51, %v1221_v7 }
 0x2cd   : > { %v1424_v43 = vsel %vm858_vm10, %v1416_v52, %v1253_v28 }
 0x2cf   : > { %v1377_v4 = vpop.permute.xlu1 %1376 }
 0x2d0   : > { %v1315_v63 = vpop.permute.xlu0 %1314  ;;  %v1458_v53 = vsel %vm1455_vm0, %v1449_v1, %v1377_v4 }
 0x2d1   : > { %v1441_v6 = vsel %vm1437_vm14, %v1432_v48, %v1315_v63 }
 0x2d2   : > { %v1450_v12 = vsel %vm1446_vm15, %v1441_v6, %v1347_v21 }
 0x2d3   : > { %v1379_v38 = vpop.permute.xlu1 %1378 }
 0x2d4   : > { %v1223_v0 = vpop.permute.xlu0 %1222 }
 0x2d7   : > { %v1317_v39 = vpop.permute.xlu1 %1316 }
 0x2d8   : > { %v1285_v40 = vpop.permute.xlu0 %1284 }
 0x2d9   : > { %v1433_v9 = vsel %vm1428_vm13, %v1424_v43, %v1285_v40 }
 0x2db   : > { %v1257_v54 = vpop.permute.xlu1 %1256 }
 0x2dc   : > { %v1163_v44 = vpop.permute.xlu0 %1162 }
 0x2df   : > { %v1291_v45 = vpop.permute.xlu1 %1290 }
 0x2e0   : > { %v1351_v16 = vpop.permute.xlu0 %1350 }
 0x2e3   : > { %v1193_v46 = vpop.permute.xlu1 %1192 }
 0x2e4   : > { %v1213_v3 = vpop.permute.xlu0 %1212  ;;  %v1410_v26 = vsel %vm822_vm7, %v2596_v36, %v1193_v46 }
 0x2e5   : > { %v1412_v55 = vsel %vm840_vm9, %v1404_v49, %v1213_v3 }
 0x2e6   : > { %v1420_v57 = vsel %vm858_vm10, %v1412_v55, %v2582_v41 }
 0x2e7   : > { %v1429_v35 = vsel %vm1428_vm13, %v1420_v57, %v2590_v47  ;;  %v1225_v59 = vpop.permute.xlu1 %1224  ;;  %v1457_v47 = vsel %vm1455_vm0, %v1448_v10, %v1375_v62  ;;  %v1459_v10 = vsel %vm1455_vm0, %v1450_v12, %v1379_v38 }
 0x2e8   : > { %v1287_v37 = vpop.permute.xlu0 %1286  ;;  %v1438_v8 = vsel %vm1437_vm14, %v1429_v35, %v2592_v50  ;;  %v1442_v50 = vsel %vm1437_vm14, %v1433_v9, %v1317_v39 }
 0x2e9   : > { %v1447_v41 = vsel %vm1446_vm15, %v1438_v8, %v2566_v34  ;;  %v1401_v34 = vsel %vm804_vm5, %v2473_v58, %v1159_v20  ;;  %v1451_v14 = vsel %vm1446_vm15, %v1442_v50, %v2604_v24 }
 0x2ea   : > { %v1456_v11 = vsel %vm1455_vm0, %v1447_v41, %v1373_v18  ;;  %v1409_v13 = vsel %vm822_vm7, %v1401_v34, %v1191_v33  ;;  %v1403_v18 = vsel %vm804_vm5, %v2554_v32, %v1163_v44  ;;  %v1418_v32 = vsel %vm840_vm9, %v1410_v26, %v1225_v59 }
 0x2eb   : > { %1808 = vmatprep.mubr.msk.f32.mxu1 %vm1473_vm1, %v1456_v11  ;;  %v1381_v42 = vpop.permute.xlu1 %1380  ;;  %v1417_v15 = vsel %vm840_vm9, %v1409_v13, %v1223_v0  ;;  %v1426_v7 = vsel %vm858_vm10, %v1418_v32, %v1257_v54 }
 0x2ec   : > { %1809 = vmatmul.mubr.msk.f32.vlgmr.msra.gmra.mxu1 %vm1473_vm1, %v1457_v47  ;;  %v1195_v19 = vpop.permute.xlu0 %1194  ;;  %v1460_v17 = vsel %vm1455_vm0, %v1451_v14, %v1381_v42  ;;  %v1425_v58 = vsel %vm858_vm10, %v1417_v15, %v2599_v56 }
 0x2ed   : > { %1811 = vmatprep.mubr.msk.f32.mxu1 %vm1473_vm1, %v1458_v53  ;;  %v1434_v20 = vsel %vm1428_vm13, %v1425_v58, %v1287_v37  ;;  %v1411_v62 = vsel %vm822_vm7, %v1403_v18, %v1195_v19 }
 0x2ef   : > { %v1289_v28 = vpop.permute.xlu1 %1288 }
 0x2f0   : > { %1812 = vmatmul.mubr.msk.f32.gmra.mxu1 %vm1473_vm1, %v1459_v10  ;;  %v1319_v60 = vpop.permute.xlu0 %1318 }
 0x2f1   : > { %1814 = vmatprep.mubr.msk.f32.mxu1 %vm1473_vm1, %v1460_v17  ;;  %v1443_v21 = vsel %vm1437_vm14, %v1434_v20, %v1319_v60 }
 0x2f2   : > { %v1452_v1 = vsel %vm1446_vm15, %v1443_v21, %v1351_v16 }
 0x2f3   : > { %v1387_v63 = vpop.permute.xlu1 %1386 }
 0x2f4   : > { %v1227_v24 = vpop.permute.xlu0 %1226 }
 0x2f5   : > { %v1419_v23 = vsel %vm840_vm9, %v1411_v62, %v1227_v24 }
 0x2f6   : > { %v1427_v25 = vsel %vm858_vm10, %v1419_v23, %v2617_v31  ;;  %v1435_v31 = vsel %vm1428_vm13, %v1426_v7, %v1289_v28 }
 0x2f7   : > { %v1436_v30 = vsel %vm1428_vm13, %v1427_v25, %v1291_v45 }
 0x2f8   : > { %v1383_v56 = vpop.permute.xlu0 %1382  ;;  %v1445_v36 = vsel %vm1437_vm14, %v1436_v30, %v2527_v27  ;;  %v1732_v27 = vld [vmem:[%s2728_s5] ss:$0 sm:$0xff] }
 0x2f9   : > { %v1461_v22 = vsel %vm1455_vm0, %v1452_v1, %v1383_v56  ;;  %v1454_v38 = vsel %vm1446_vm15, %v1445_v36, %v2545_v61  ;;  %v1733_v61 = vld [vmem:[%s2729_s6] ss:$0 sm:$0xff] }
 0x2fa   : > { %1815 = vmatmul.mubr.msk.f32.gmra.mxu1 %vm1473_vm1, %v1461_v22  ;;  %v1463_v54 = vsel %vm1455_vm0, %v1454_v38, %v1387_v63 }
 0x2fc   : > { %v1321_v33 = vpop.permute.xlu0 %1320 }
 0x2fd   : > { %v1444_v4 = vsel %vm1437_vm14, %v1435_v31, %v1321_v33 }
 0x2fe   : > { %v1453_v0 = vsel %vm1446_vm15, %v1444_v4, %v2620_v29 }
 0x300   : > { %v1385_v39 = vpop.permute.xlu0 %1384 }
 0x301   : > { %v1462_v40 = vsel %vm1455_vm0, %v1453_v0, %v1385_v39 }
 0x302   : > { %1817 = vmatprep.mubr.msk.f32.mxu1 %vm1473_vm1, %v1462_v40 }
 0x303   : > { %1818 = vmatmul.mubr.msk.f32.gmra.mxu1 %vm1473_vm1, %v1463_v54 }
 0x3ac   : > { %v1810_v44 = vpop.f32.mrf.mxu1 }
 0x3ad   : > { %v1611_v29 = vmul.f32 %v1810_v44, %v1732_v27 }
 0x3ae   : > { %v1564_v45 = vpop.f32.mrf.mxu1 }
 0x3af   : > { %v1626_v16 = vadd.f32 %v1733_v61, %v1611_v29  ;;  %v1610_v2 = vmul.f32 %v1732_v27, %v1564_v45 }
 0x3b0   : > { %v1813_v5 = vpop.f32.mrf.mxu1 }
 0x3b1   : > { %v1634_v46 = vmax.f32 %v1626_v16, 0.0  ;;  %v1625_v49 = vadd.f32 %v1733_v61, %v1610_v2  ;;  %v1613_v51 = vmul.f32 %v1813_v5, %v1732_v27 }
 0x3b2   : > { %v1574_v3 = vpop.f32.mrf.mxu1 }
 0x3b3   : > { %1642 = vst.msk [vmem:[%s2702_s14 + $0x8] sm:$0xff] %vm804_vm5, %v1634_v46  ;;  %v1633_v52 = vmax.f32 %v1625_v49, 0.0  ;;  %v1628_v55 = vadd.f32 %v1733_v61, %v1613_v51  ;;  %v1612_v57 = vmul.f32 %v1732_v27, %v1574_v3 }
 0x3b5   : > { %1641 = vst.msk [vmem:[%s2702_s14] sm:$0xff] %vm804_vm5, %v1633_v52  ;;  %v1636_v35 = vmax.f32 %v1628_v55, 0.0  ;;  %v1627_v59 = vadd.f32 %v1733_v61, %v1612_v57 }
 0x3b7   : > { %1644 = vst.msk [vmem:[%s2702_s14 + $0x18] sm:$0xff] %vm804_vm5, %v1636_v35  ;;  %v1635_v48 = vmax.f32 %v1627_v59, 0.0 }
 0x3b9   : > { %1643 = vst.msk [vmem:[%s2702_s14 + $0x10] sm:$0xff] %vm804_vm5, %v1635_v48 }
 0x3ba   : > { %v1816_v43 = vpop.f32.mrf.mxu1 }
 0x3bb   : > { %v1615_v37 = vmul.f32 %v1816_v43, %v1732_v27 }
 0x3bc   : > { %v1584_v8 = vpop.f32.mrf.mxu1 }
 0x3bd   : > { %v1630_v6 = vadd.f32 %v1733_v61, %v1615_v37  ;;  %v1614_v9 = vmul.f32 %v1732_v27, %v1584_v8 }
 0x3bf   : > { %v1638_v41 = vmax.f32 %v1630_v6, 0.0  ;;  %v1629_v11 = vadd.f32 %v1733_v61, %v1614_v9 }
 0x3c1   : > { %1646 = vst.msk [vmem:[%s2702_s14 + $0x28] sm:$0xff] %vm804_vm5, %v1638_v41  ;;  %v1637_v47 = vmax.f32 %v1629_v11, 0.0 }
 0x3c3   : > { %1645 = vst.msk [vmem:[%s2702_s14 + $0x20] sm:$0xff] %vm804_vm5, %v1637_v47  ;;  %v1819_v53 = vpop.f32.mrf.mxu1 }
 0x3c4   : > { %v1617_v12 = vmul.f32 %v1819_v53, %v1732_v27 }
 0x3c5   : > { %v1594_v50 = vpop.f32.mrf.mxu1 }
 0x3c6   : > { %v1632_v19 = vadd.f32 %v1733_v61, %v1617_v12  ;;  %v1616_v42 = vmul.f32 %v1732_v27, %v1594_v50 }
 0x3c8   : > { %v1640_v34 = vmax.f32 %v1632_v19, 0.0  ;;  %v1631_v13 = vadd.f32 %v1733_v61, %v1616_v42 }
 0x3ca   : > { %1648 = vst.msk [vmem:[%s2702_s14 + $0x38] sm:$0xff] %vm804_vm5, %v1640_v34  ;;  %v1639_v10 = vmax.f32 %v1631_v13, 0.0 }
 0x3cc   : > { %1647 = vst.msk [vmem:[%s2702_s14 + $0x30] sm:$0xff] %vm804_vm5, %v1639_v10 }
 0x3cd PF: > { %s17_s24 = sadd.s32 1, %s1848_s24  }
 0x3ce   : > { %p14_p4 = scmp.ge.s32.totalorder %s17_s24, 4  }
 0x3d0   :  { %16 = sbr.rel (!%p14_p4) target bundleno = 1 (0x1), region = 78 }

</bundles_post_ra>
